<compile_context>
chip_gen: v7x
topology: tpu7x:2x2x1
jax: 0.10.0
libtpu: 0.0.40
codegen_flags: <defaults>
</compile_context>

<pallas_src>
import jax
import jax.numpy as jnp
from jax.experimental import pallas as pl
from jax.experimental.pallas import tpu as pltpu

# small synthetic config (batch, seq, hidden, heads, ffn, vocab, layers)
B, S, H, NH, FF, V, L = 2, 8, 32, 2, 64, 128, 2
DH = H // NH
EPS = 1e-5
NEG = -1e9
SCALE = 1.0 / float(DH) ** 0.5

TL = 128                      # lane-tile width
W_LANES = (3 * NH + 2) * TL   # [Q heads | K heads | V heads | w1 | wdec] tiles
PROJ_ROWS = (NH + 1) * TL + H  # [wo_pad (NH*128) | w2_pad (128) | wd (H)]

# packing assumptions (guard against silent corruption on config changes)
assert NH * DH == H
assert S <= 8 and H <= TL and DH <= TL and FF <= TL and V <= TL
assert H % 8 == 0 and FF % 8 == 0 and S % 8 == 0 and V % TL == 0


def _layernorm(x, g, b):
    mu = jnp.mean(x, axis=-1, keepdims=True)
    var = jnp.mean((x - mu) ** 2, axis=-1, keepdims=True)
    return (x - mu) * jax.lax.rsqrt(var + EPS) * g + b


def _mlm_kernel(x_ref, mask_ref, w_ref, proj_ref, glob_ref, out_ref):
    bb = x_ref.shape[0]                       # whole batch in one grid step
    x = x_ref[...]                            # (bb, S, H)
    mask = mask_ref[...]                      # (bb, 1, S) float
    attn_bias = jnp.where(mask > 0.5, 0.0, NEG)            # (bb, 1, S)

    g = glob_ref[...]                         # (16, 128) packed globals
    pos = g[0:S, 0:H]                         # (S, H) position embeddings
    eg, eb = g[8:9, 0:H], g[9:10, 0:H]        # embedding LN
    bd, gh, bh = g[10:11, 0:H], g[11:12, 0:H], g[12:13, 0:H]   # LM head vecs
    bdec = g[13:14, 0:V]

    # embeddings: inputs_embeds + position embeddings, LayerNorm; flatten batch
    h = _layernorm((x + pos[None, :, :]).reshape(bb * S, H), eg, eb)

    for l in range(L):
        w_l = w_ref[l]                        # (40, W_LANES) per-layer slab
        wqkv = w_l[0:H, 0:3 * NH * TL]        # (H, 3*NH*128) per-head padded
        w1p = w_l[0:H, 3 * NH * TL:(3 * NH + 1) * TL]          # (H, 128)
        brow = w_l[H:H + 1, :]                # padded bias row
        bqkv = brow[:, 0:3 * NH * TL]         # (1, 3*NH*128)
        d1p = brow[:, 3 * NH * TL:(3 * NH + 1) * TL]           # (1, 128)
        bo = w_l[H + 1:H + 2, 0:H]
        g1 = w_l[H + 2:H + 3, 0:H]
        c1 = w_l[H + 3:H + 4, 0:H]
        d2 = w_l[H + 4:H + 5, 0:H]
        g2 = w_l[H + 5:H + 6, 0:H]
        c2 = w_l[H + 6:H + 7, 0:H]

        pj = proj_ref[l]                      # (PROJ_ROWS, H)
        wo_pad = pj[0:NH * TL, :]             # (NH*128, H) per-head padded wo
        w2_pad = pj[NH * TL:(NH + 1) * TL, :]  # (128, H), rows FF: are zero

        # --- fused QKV projection: one matmul + one bias add for the block ---
        qkv = jnp.dot(h, wqkv,
                      preferred_element_type=jnp.float32) + bqkv  # (bb*S,3*NH*128)

        # --- multi-head self attention (all slices are whole 128-lane tiles) ---
        ctx_rows = []
        for b in range(bb):
            qkv_b = qkv[b * S:(b + 1) * S, :]          # (S, 3*NH*128)
            bias_b = attn_bias[b]                      # (1, S)
            heads = []
            for hd in range(NH):
                qh = qkv_b[:, hd * TL:(hd + 1) * TL]                       # (S,128)
                kh = qkv_b[:, (NH + hd) * TL:(NH + hd + 1) * TL]           # (S,128)
                vh = qkv_b[:, (2 * NH + hd) * TL:(2 * NH + hd + 1) * TL]   # (S,128)
                s = jax.lax.dot_general(qh, kh, (((1,), (1,)), ((), ())),
                                        preferred_element_type=jnp.float32)
                s = s * SCALE + bias_b                 # (S, S)
                s = s - jnp.max(s, axis=-1, keepdims=True)
                e = jnp.exp(s)
                p = e * pl.reciprocal(jnp.sum(e, axis=-1, keepdims=True),
                                      approx=True)
                heads.append(jnp.dot(p, vh, preferred_element_type=jnp.float32))
            ctx_rows.append(jnp.concatenate(heads, axis=-1))      # (S, NH*128)
        ctx = jnp.concatenate(ctx_rows, axis=0)                   # (bb*S, NH*128)
        # single output projection for all heads & all examples (padded wo)
        attn_out = jnp.dot(ctx, wo_pad,
                           preferred_element_type=jnp.float32) + bo
        h = _layernorm(h + attn_out, g1, c1)

        # --- feed forward (intermediate padded to a full 128-lane tile) ---
        fp = jax.nn.gelu(jnp.dot(h, w1p,
                                 preferred_element_type=jnp.float32) + d1p)
        f = jnp.dot(fp, w2_pad, preferred_element_type=jnp.float32) + d2
        h = _layernorm(h + f, g2, c2)

    # --- LM head: dense + gelu + LN + decoder to vocab ---
    wd = proj_ref[0][(NH + 1) * TL:(NH + 1) * TL + H, :]          # (H, H)
    wdec = w_ref[0][0:H, (3 * NH + 1) * TL:(3 * NH + 2) * TL]     # (H, V=128)
    t = jax.nn.gelu(jnp.dot(h, wd, preferred_element_type=jnp.float32) + bd)
    t = _layernorm(t, gh, bh)
    logits = jnp.dot(t, wdec,
                     preferred_element_type=jnp.float32) + bdec   # (bb*S, V)
    out_ref[...] = logits.reshape(bb, S, V)


def init_params(key):
    ks = jax.random.split(key, 10)
    std = 0.02
    p = {}
    p["pos"] = jax.random.normal(ks[0], (S, H)) * std
    p["eg"] = jnp.ones((1, H));  p["eb"] = jnp.zeros((1, H))
    p["wq"] = jax.random.normal(ks[1], (L, H, H)) * std
    p["wk"] = jax.random.normal(ks[2], (L, H, H)) * std
    p["wv"] = jax.random.normal(ks[3], (L, H, H)) * std
    p["wo"] = jax.random.normal(ks[4], (L, H, H)) * std
    p["bq"] = jnp.zeros((L, 1, H)); p["bk"] = jnp.zeros((L, 1, H))
    p["bv"] = jnp.zeros((L, 1, H)); p["bo"] = jnp.zeros((L, 1, H))
    p["g1"] = jnp.ones((L, 1, H));  p["c1"] = jnp.zeros((L, 1, H))
    p["w1"] = jax.random.normal(ks[5], (L, H, FF)) * std
    p["d1"] = jnp.zeros((L, 1, FF))
    p["w2"] = jax.random.normal(ks[6], (L, FF, H)) * std
    p["d2"] = jnp.zeros((L, 1, H))
    p["g2"] = jnp.ones((L, 1, H));  p["c2"] = jnp.zeros((L, 1, H))
    p["wd"] = jax.random.normal(ks[7], (H, H)) * std
    p["bd"] = jnp.zeros((1, H))
    p["gh"] = jnp.ones((1, H));     p["bh"] = jnp.zeros((1, H))
    p["wdec"] = jax.random.normal(ks[8], (H, V)) * std
    p["bdec"] = jnp.zeros((1, V))
    return p


def pack_params(p):
    """Pack the 25 small weight/bias arrays into 3 lane-aligned kernel slabs.

    w32  : (L, H+8, W_LANES)  per-layer [Q|K|V per-head-padded | w1_pad | wdec@l0]
                              plus a padded bias row and the 32-lane LN/bias rows.
    proj : (L, PROJ_ROWS, H)  per-layer [wo per-head-padded | w2_pad | wd@l0].
    glob : (16, 128)          pos-emb, embedding-LN, LM-head vectors, bdec.
    """
    w32 = jnp.zeros((L, H + 8, W_LANES), jnp.float32)
    proj = jnp.zeros((L, PROJ_ROWS, H), jnp.float32)
    for hd in range(NH):
        cs = slice(hd * DH, (hd + 1) * DH)
        # Q / K / V weight columns of head `hd` land at the start of their own
        # 128-lane tile; all padded lanes stay zero (math-neutral).
        w32 = w32.at[:, 0:H, hd * TL:hd * TL + DH].set(p["wq"][:, :, cs])
        w32 = w32.at[:, 0:H, (NH + hd) * TL:(NH + hd) * TL + DH].set(p["wk"][:, :, cs])
        w32 = w32.at[:, 0:H, (2 * NH + hd) * TL:(2 * NH + hd) * TL + DH].set(p["wv"][:, :, cs])
        w32 = w32.at[:, H, hd * TL:hd * TL + DH].set(p["bq"][:, 0, cs])
        w32 = w32.at[:, H, (NH + hd) * TL:(NH + hd) * TL + DH].set(p["bk"][:, 0, cs])
        w32 = w32.at[:, H, (2 * NH + hd) * TL:(2 * NH + hd) * TL + DH].set(p["bv"][:, 0, cs])
        # wo rows of head `hd` land at the start of their own 128-sublane block
        proj = proj.at[:, hd * TL:hd * TL + DH, :].set(p["wo"][:, hd * DH:(hd + 1) * DH, :])
    w32 = w32.at[:, 0:H, 3 * NH * TL:3 * NH * TL + FF].set(p["w1"])
    w32 = w32.at[:, H, 3 * NH * TL:3 * NH * TL + FF].set(p["d1"][:, 0, :])
    w32 = w32.at[0, 0:H, (3 * NH + 1) * TL:(3 * NH + 1) * TL + V].set(p["wdec"])
    w32 = w32.at[:, H + 1, 0:H].set(p["bo"][:, 0, :])
    w32 = w32.at[:, H + 2, 0:H].set(p["g1"][:, 0, :])
    w32 = w32.at[:, H + 3, 0:H].set(p["c1"][:, 0, :])
    w32 = w32.at[:, H + 4, 0:H].set(p["d2"][:, 0, :])
    w32 = w32.at[:, H + 5, 0:H].set(p["g2"][:, 0, :])
    w32 = w32.at[:, H + 6, 0:H].set(p["c2"][:, 0, :])

    proj = proj.at[:, NH * TL:NH * TL + FF, :].set(p["w2"])
    proj = proj.at[0, (NH + 1) * TL:(NH + 1) * TL + H, :].set(p["wd"])

    glob = jnp.zeros((16, 128), jnp.float32)
    glob = glob.at[0:S, 0:H].set(p["pos"])
    glob = glob.at[8, 0:H].set(p["eg"][0])
    glob = glob.at[9, 0:H].set(p["eb"][0])
    glob = glob.at[10, 0:H].set(p["bd"][0])
    glob = glob.at[11, 0:H].set(p["gh"][0])
    glob = glob.at[12, 0:H].set(p["bh"][0])
    glob = glob.at[13, 0:V].set(p["bdec"][0])
    return dict(w32=w32, proj=proj, glob=glob)


def inversion_plm_forward(x, label=None, attention_mask=None, packed=None):
    bsz = x.shape[0]
    if attention_mask is None:
        attention_mask = jnp.ones((bsz, S), jnp.float32)
    mask3 = attention_mask.astype(jnp.float32).reshape(bsz, 1, S)

    # Whole batch fused into a single grid step on every TPU generation:
    # at this size the kernel is launch/DMA-setup bound, and splitting the
    # batch would only duplicate all weight-slab DMAs (see review item 5).
    def full(a):
        nd = a.ndim
        return pl.BlockSpec(a.shape, lambda i, _nd=nd: (0,) * _nd)

    in_specs = [pl.BlockSpec((bsz, S, H), lambda i: (0, 0, 0)),
                pl.BlockSpec((bsz, 1, S), lambda i: (0, 0, 0)),
                full(packed["w32"]), full(packed["proj"]), full(packed["glob"])]
    logits = pl.pallas_call(
        _mlm_kernel,
        out_shape=jax.ShapeDtypeStruct((bsz, S, V), jnp.float32),
        grid=(1,),
        in_specs=in_specs,
        out_specs=pl.BlockSpec((bsz, S, V), lambda i: (0, 0, 0)),
        compiler_params=pltpu.CompilerParams(
            dimension_semantics=("arbitrary",)),
    )(x, mask3, packed["w32"], packed["proj"], packed["glob"])

    loss = None
    if label is not None:
        # MLM token-level cross entropy with ignore_index = -100.
        # TODO(synk): loss is a tiny reduction computed in plain JAX from the
        # kernel's logits rather than inside the Pallas kernel.
        valid = label != -100
        safe = jnp.where(valid, label, 0)
        logp = jax.nn.log_softmax(logits, axis=-1)
        nll = -jnp.take_along_axis(logp, safe[..., None], axis=-1)[..., 0]
        loss = jnp.sum(jnp.where(valid, nll, 0.0)) / jnp.maximum(
            jnp.sum(valid.astype(jnp.float32)), 1.0)
    return logits, loss


def reference_forward(x, attention_mask, p):
    """Pure-JAX mirror (per-token logits), for correctness checking."""
    mask = attention_mask.astype(jnp.float32)
    outs = []
    for b in range(x.shape[0]):
        h = _layernorm(x[b] + p["pos"], p["eg"], p["eb"])
        bias = jnp.where(mask[b][None, :] > 0.5, 0.0, NEG)
        for l in range(L):
            q = h @ p["wq"][l] + p["bq"][l]
            k = h @ p["wk"][l] + p["bk"][l]
            v = h @ p["wv"][l] + p["bv"][l]
            attn_out = jnp.zeros((S, H), jnp.float32)
            for hd in range(NH):
                sl = slice(hd * DH, (hd + 1) * DH)
                qh, kh, vh = q[:, sl], k[:, sl], v[:, sl]
                s = (qh @ kh.T) * SCALE + bias
                s = s - jnp.max(s, axis=-1, keepdims=True)
                e = jnp.exp(s)
                pr = e / jnp.sum(e, axis=-1, keepdims=True)
                attn_out = attn_out + (pr @ vh) @ p["wo"][l][sl, :]
            attn_out = attn_out + p["bo"][l]
            h = _layernorm(h + attn_out, p["g1"][l], p["c1"][l])
            f = jax.nn.gelu(h @ p["w1"][l] + p["d1"][l]) @ p["w2"][l] + p["d2"][l]
            h = _layernorm(h + f, p["g2"][l], p["c2"][l])
        t = jax.nn.gelu(h @ p["wd"] + p["bd"])
        t = _layernorm(t, p["gh"], p["bh"])
        outs.append(t @ p["wdec"] + p["bdec"])
    return jnp.stack(outs)


if __name__ == "__main__":
    key = jax.random.PRNGKey(0)
    kx, kp, kl = jax.random.split(key, 3)
    x = jax.random.normal(kx, (B, S, H), jnp.float32)
    lens = jnp.array([S, S - 3])
    attention_mask = (jnp.arange(S)[None, :] < lens[:, None]).astype(jnp.float32)
    labels = jax.random.randint(kl, (B, S), 0, V)
    labels = jnp.where(attention_mask > 0.5, labels, -100)

    params = init_params(kp)
    packed = pack_params(params)

    logits, loss = inversion_plm_forward(x, labels, attention_mask, packed)
    jax.block_until_ready(logits)

    ref = reference_forward(x, attention_mask, params)
    assert logits.shape == (B, S, V)
    err = float(jnp.max(jnp.abs(logits - ref)))
    assert jnp.allclose(logits, ref, atol=5e-3, rtol=5e-3), err
    assert loss is not None and bool(jnp.isfinite(loss))
    print("KERNEL_OK")
</pallas_src>

<mosaic_0001>
module attributes {stable_mosaic.version = 11 : i64} {
  func.func @_mlm_kernel(%arg0: i32, %arg1: memref<2x8x32xf32, #tpu.memory_space<vmem>>, %arg2: memref<2x1x8xf32, #tpu.memory_space<vmem>>, %arg3: memref<2x40x1024xf32, #tpu.memory_space<vmem>>, %arg4: memref<2x416x32xf32, #tpu.memory_space<vmem>>, %arg5: memref<16x128xf32, #tpu.memory_space<vmem>>, %arg6: memref<2x8x128xf32, #tpu.memory_space<vmem>>) attributes {dimension_semantics = [#tpu.dimension_semantics<arbitrary>], iteration_bounds = array<i64: 1>, scalar_prefetch = 0 : i64, scratch_operands = 0 : i64, tpu.core_type = #tpu.core_type<tc>, window_params = [{pipeline_mode = #tpu.pipeline_mode<synchronous>, transform_indices = @transform_0, window_bounds = array<i64: 2, 8, 32>}, {pipeline_mode = #tpu.pipeline_mode<synchronous>, transform_indices = @transform_1, window_bounds = array<i64: 2, 1, 8>}, {pipeline_mode = #tpu.pipeline_mode<synchronous>, transform_indices = @transform_2, window_bounds = array<i64: 2, 40, 1024>}, {pipeline_mode = #tpu.pipeline_mode<synchronous>, transform_indices = @transform_3, window_bounds = array<i64: 2, 416, 32>}, {pipeline_mode = #tpu.pipeline_mode<synchronous>, transform_indices = @transform_4, window_bounds = array<i64: 16, 128>}, {pipeline_mode = #tpu.pipeline_mode<synchronous>, transform_indices = @transform_5, window_bounds = array<i64: 2, 8, 128>}]} {
    %c0 = arith.constant 0 : index
    %c0_0 = arith.constant 0 : index
    %c0_1 = arith.constant 0 : index
    %0 = vector.load %arg1[%c0, %c0_0, %c0_1] : memref<2x8x32xf32, #tpu.memory_space<vmem>>, vector<2x8x32xf32>
    %c0_2 = arith.constant 0 : index
    %c0_3 = arith.constant 0 : index
    %c0_4 = arith.constant 0 : index
    %1 = vector.load %arg2[%c0_2, %c0_3, %c0_4] : memref<2x1x8xf32, #tpu.memory_space<vmem>>, vector<2x1x8xf32>
    %cst = arith.constant 5.000000e-01 : f32
    %2 = vector.broadcast %cst : f32 to vector<2x1x8xf32>
    %3 = arith.cmpf ogt, %1, %2 : vector<2x1x8xf32>
    %cst_5 = arith.constant 0.000000e+00 : f32
    %cst_6 = arith.constant -1.000000e+09 : f32
    %4 = vector.broadcast %cst_5 : f32 to vector<2x1x8xf32>
    %5 = vector.broadcast %cst_6 : f32 to vector<2x1x8xf32>
    %6 = arith.select %3, %4, %5 : vector<2x1x8xi1>, vector<2x1x8xf32>
    %c0_7 = arith.constant 0 : index
    %c0_8 = arith.constant 0 : index
    %7 = vector.load %arg5[%c0_7, %c0_8] : memref<16x128xf32, #tpu.memory_space<vmem>>, vector<16x128xf32>
    %8 = vector.extract_strided_slice %7 {offsets = [0, 0], sizes = [8, 32], strides = [1, 1]} : vector<16x128xf32> to vector<8x32xf32>
    %9 = vector.extract_strided_slice %7 {offsets = [8, 0], sizes = [1, 32], strides = [1, 1]} : vector<16x128xf32> to vector<1x32xf32>
    %10 = vector.extract_strided_slice %7 {offsets = [9, 0], sizes = [1, 32], strides = [1, 1]} : vector<16x128xf32> to vector<1x32xf32>
    %11 = vector.extract_strided_slice %7 {offsets = [10, 0], sizes = [1, 32], strides = [1, 1]} : vector<16x128xf32> to vector<1x32xf32>
    %12 = vector.extract_strided_slice %7 {offsets = [11, 0], sizes = [1, 32], strides = [1, 1]} : vector<16x128xf32> to vector<1x32xf32>
    %13 = vector.extract_strided_slice %7 {offsets = [12, 0], sizes = [1, 32], strides = [1, 1]} : vector<16x128xf32> to vector<1x32xf32>
    %14 = vector.extract_strided_slice %7 {offsets = [13, 0], sizes = [1, 128], strides = [1, 1]} : vector<16x128xf32> to vector<1x128xf32>
    %15 = vector.shape_cast %8 : vector<8x32xf32> to vector<1x8x32xf32>
    %16 = vector.broadcast %15 : vector<1x8x32xf32> to vector<2x8x32xf32>
    %17 = arith.addf %0, %16 : vector<2x8x32xf32>
    %18 = vector.shape_cast %17 : vector<2x8x32xf32> to vector<16x32xf32>
    %cst_9 = arith.constant dense<0.000000e+00> : vector<16xf32>
    %19 = vector.multi_reduction <add>, %18, %cst_9 [1] : vector<16x32xf32> to vector<16xf32>
    %20 = vector.shape_cast %19 : vector<16xf32> to vector<16x1xf32>
    %cst_10 = arith.constant 3.200000e+01 : f32
    %21 = vector.broadcast %cst_10 : f32 to vector<16x1xf32>
    %22 = arith.divf %20, %21 : vector<16x1xf32>
    %23 = vector.broadcast %22 : vector<16x1xf32> to vector<16x32xf32>
    %24 = arith.subf %18, %23 : vector<16x32xf32>
    %25 = arith.mulf %24, %24 : vector<16x32xf32>
    %cst_11 = arith.constant dense<0.000000e+00> : vector<16xf32>
    %26 = vector.multi_reduction <add>, %25, %cst_11 [1] : vector<16x32xf32> to vector<16xf32>
    %27 = vector.shape_cast %26 : vector<16xf32> to vector<16x1xf32>
    %cst_12 = arith.constant 3.200000e+01 : f32
    %28 = vector.broadcast %cst_12 : f32 to vector<16x1xf32>
    %29 = arith.divf %27, %28 : vector<16x1xf32>
    %30 = vector.broadcast %22 : vector<16x1xf32> to vector<16x32xf32>
    %31 = arith.subf %18, %30 : vector<16x32xf32>
    %cst_13 = arith.constant 9.99999974E-6 : f32
    %32 = vector.broadcast %cst_13 : f32 to vector<16x1xf32>
    %33 = arith.addf %29, %32 : vector<16x1xf32>
    %34 = math.rsqrt %33 : vector<16x1xf32>
    %35 = vector.broadcast %34 : vector<16x1xf32> to vector<16x32xf32>
    %36 = arith.mulf %31, %35 : vector<16x32xf32>
    %37 = vector.broadcast %9 : vector<1x32xf32> to vector<16x32xf32>
    %38 = arith.mulf %36, %37 : vector<16x32xf32>
    %39 = vector.broadcast %10 : vector<1x32xf32> to vector<16x32xf32>
    %40 = arith.addf %38, %39 : vector<16x32xf32>
    %c0_14 = arith.constant 0 : index
    %c0_15 = arith.constant 0 : index
    %c0_16 = arith.constant 0 : index
    %41 = vector.load %arg3[%c0_14, %c0_15, %c0_16] : memref<2x40x1024xf32, #tpu.memory_space<vmem>>, vector<1x40x1024xf32>
    %42 = vector.shape_cast %41 : vector<1x40x1024xf32> to vector<40x1024xf32>
    %43 = vector.extract_strided_slice %42 {offsets = [0, 0], sizes = [32, 768], strides = [1, 1]} : vector<40x1024xf32> to vector<32x768xf32>
    %44 = vector.extract_strided_slice %42 {offsets = [0, 768], sizes = [32, 128], strides = [1, 1]} : vector<40x1024xf32> to vector<32x128xf32>
    %45 = vector.extract_strided_slice %42 {offsets = [32, 0], sizes = [1, 1024], strides = [1, 1]} : vector<40x1024xf32> to vector<1x1024xf32>
    %46 = vector.extract_strided_slice %45 {offsets = [0, 0], sizes = [1, 768], strides = [1, 1]} : vector<1x1024xf32> to vector<1x768xf32>
    %47 = vector.extract_strided_slice %45 {offsets = [0, 768], sizes = [1, 128], strides = [1, 1]} : vector<1x1024xf32> to vector<1x128xf32>
    %48 = vector.extract_strided_slice %42 {offsets = [33, 0], sizes = [1, 32], strides = [1, 1]} : vector<40x1024xf32> to vector<1x32xf32>
    %49 = vector.extract_strided_slice %42 {offsets = [34, 0], sizes = [1, 32], strides = [1, 1]} : vector<40x1024xf32> to vector<1x32xf32>
    %50 = vector.extract_strided_slice %42 {offsets = [35, 0], sizes = [1, 32], strides = [1, 1]} : vector<40x1024xf32> to vector<1x32xf32>
    %51 = vector.extract_strided_slice %42 {offsets = [36, 0], sizes = [1, 32], strides = [1, 1]} : vector<40x1024xf32> to vector<1x32xf32>
    %52 = vector.extract_strided_slice %42 {offsets = [37, 0], sizes = [1, 32], strides = [1, 1]} : vector<40x1024xf32> to vector<1x32xf32>
    %53 = vector.extract_strided_slice %42 {offsets = [38, 0], sizes = [1, 32], strides = [1, 1]} : vector<40x1024xf32> to vector<1x32xf32>
    %c0_17 = arith.constant 0 : index
    %c0_18 = arith.constant 0 : index
    %c0_19 = arith.constant 0 : index
    %54 = vector.load %arg4[%c0_17, %c0_18, %c0_19] : memref<2x416x32xf32, #tpu.memory_space<vmem>>, vector<1x416x32xf32>
    %55 = vector.shape_cast %54 : vector<1x416x32xf32> to vector<416x32xf32>
    %56 = vector.extract_strided_slice %55 {offsets = [0, 0], sizes = [256, 32], strides = [1, 1]} : vector<416x32xf32> to vector<256x32xf32>
    %57 = vector.extract_strided_slice %55 {offsets = [256, 0], sizes = [128, 32], strides = [1, 1]} : vector<416x32xf32> to vector<128x32xf32>
    %cst_20 = arith.constant dense<0.000000e+00> : vector<16x768xf32>
    %58 = tpu.matmul %40, %43, %cst_20 {dimension_numbers = #tpu.dot_dimension_numbers<[1], [0], [0], [1], [0, 0, 1, 1], [], []>} : vector<16x32xf32>, vector<32x768xf32>, vector<16x768xf32> -> vector<16x768xf32>
    %59 = vector.broadcast %46 : vector<1x768xf32> to vector<16x768xf32>
    %60 = arith.addf %58, %59 : vector<16x768xf32>
    %61 = vector.extract_strided_slice %60 {offsets = [0, 0], sizes = [8, 768], strides = [1, 1]} : vector<16x768xf32> to vector<8x768xf32>
    %62 = vector.extract_strided_slice %6 {offsets = [0, 0, 0], sizes = [1, 1, 8], strides = [1, 1, 1]} : vector<2x1x8xf32> to vector<1x1x8xf32>
    %63 = vector.shape_cast %62 : vector<1x1x8xf32> to vector<1x8xf32>
    %64 = vector.extract_strided_slice %61 {offsets = [0, 0], sizes = [8, 128], strides = [1, 1]} : vector<8x768xf32> to vector<8x128xf32>
    %65 = vector.extract_strided_slice %61 {offsets = [0, 256], sizes = [8, 128], strides = [1, 1]} : vector<8x768xf32> to vector<8x128xf32>
    %66 = vector.extract_strided_slice %61 {offsets = [0, 512], sizes = [8, 128], strides = [1, 1]} : vector<8x768xf32> to vector<8x128xf32>
    %cst_21 = arith.constant dense<0.000000e+00> : vector<8x8xf32>
    %67 = tpu.matmul %64, %65, %cst_21 {dimension_numbers = #tpu.dot_dimension_numbers<[1], [1], [0], [0], [0, 0, 1, 0], [], []>} : vector<8x128xf32>, vector<8x128xf32>, vector<8x8xf32> -> vector<8x8xf32>
    %cst_22 = arith.constant 2.500000e-01 : f32
    %68 = vector.broadcast %cst_22 : f32 to vector<8x8xf32>
    %69 = arith.mulf %67, %68 : vector<8x8xf32>
    %70 = vector.broadcast %63 : vector<1x8xf32> to vector<8x8xf32>
    %71 = arith.addf %69, %70 : vector<8x8xf32>
    %cst_23 = arith.constant dense<0xFF800000> : vector<8xf32>
    %72 = vector.multi_reduction <maximumf>, %71, %cst_23 [1] : vector<8x8xf32> to vector<8xf32>
    %73 = vector.shape_cast %72 : vector<8xf32> to vector<8x1xf32>
    %74 = vector.broadcast %73 : vector<8x1xf32> to vector<8x8xf32>
    %75 = arith.subf %71, %74 : vector<8x8xf32>
    %76 = math.exp %75 : vector<8x8xf32>
    %cst_24 = arith.constant dense<0.000000e+00> : vector<8xf32>
    %77 = vector.multi_reduction <add>, %76, %cst_24 [1] : vector<8x8xf32> to vector<8xf32>
    %78 = vector.shape_cast %77 : vector<8xf32> to vector<8x1xf32>
    %79 = tpu.reciprocal %78 {approx = true} : vector<8x1xf32> -> vector<8x1xf32>
    %80 = vector.broadcast %79 : vector<8x1xf32> to vector<8x8xf32>
    %81 = arith.mulf %76, %80 : vector<8x8xf32>
    %cst_25 = arith.constant dense<0.000000e+00> : vector<8x128xf32>
    %82 = tpu.matmul %81, %66, %cst_25 {dimension_numbers = #tpu.dot_dimension_numbers<[1], [0], [0], [1], [0, 0, 1, 1], [], []>} : vector<8x8xf32>, vector<8x128xf32>, vector<8x128xf32> -> vector<8x128xf32>
    %83 = vector.extract_strided_slice %61 {offsets = [0, 128], sizes = [8, 128], strides = [1, 1]} : vector<8x768xf32> to vector<8x128xf32>
    %84 = vector.extract_strided_slice %61 {offsets = [0, 384], sizes = [8, 128], strides = [1, 1]} : vector<8x768xf32> to vector<8x128xf32>
    %85 = vector.extract_strided_slice %61 {offsets = [0, 640], sizes = [8, 128], strides = [1, 1]} : vector<8x768xf32> to vector<8x128xf32>
    %cst_26 = arith.constant dense<0.000000e+00> : vector<8x8xf32>
    %86 = tpu.matmul %83, %84, %cst_26 {dimension_numbers = #tpu.dot_dimension_numbers<[1], [1], [0], [0], [0, 0, 1, 0], [], []>} : vector<8x128xf32>, vector<8x128xf32>, vector<8x8xf32> -> vector<8x8xf32>
    %cst_27 = arith.constant 2.500000e-01 : f32
    %87 = vector.broadcast %cst_27 : f32 to vector<8x8xf32>
    %88 = arith.mulf %86, %87 : vector<8x8xf32>
    %89 = vector.broadcast %63 : vector<1x8xf32> to vector<8x8xf32>
    %90 = arith.addf %88, %89 : vector<8x8xf32>
    %cst_28 = arith.constant dense<0xFF800000> : vector<8xf32>
    %91 = vector.multi_reduction <maximumf>, %90, %cst_28 [1] : vector<8x8xf32> to vector<8xf32>
    %92 = vector.shape_cast %91 : vector<8xf32> to vector<8x1xf32>
    %93 = vector.broadcast %92 : vector<8x1xf32> to vector<8x8xf32>
    %94 = arith.subf %90, %93 : vector<8x8xf32>
    %95 = math.exp %94 : vector<8x8xf32>
    %cst_29 = arith.constant dense<0.000000e+00> : vector<8xf32>
    %96 = vector.multi_reduction <add>, %95, %cst_29 [1] : vector<8x8xf32> to vector<8xf32>
    %97 = vector.shape_cast %96 : vector<8xf32> to vector<8x1xf32>
    %98 = tpu.reciprocal %97 {approx = true} : vector<8x1xf32> -> vector<8x1xf32>
    %99 = vector.broadcast %98 : vector<8x1xf32> to vector<8x8xf32>
    %100 = arith.mulf %95, %99 : vector<8x8xf32>
    %cst_30 = arith.constant dense<0.000000e+00> : vector<8x128xf32>
    %101 = tpu.matmul %100, %85, %cst_30 {dimension_numbers = #tpu.dot_dimension_numbers<[1], [0], [0], [1], [0, 0, 1, 1], [], []>} : vector<8x8xf32>, vector<8x128xf32>, vector<8x128xf32> -> vector<8x128xf32>
    %102 = tpu.concatenate %82, %101 in 1 : vector<8x128xf32>, vector<8x128xf32> -> vector<8x256xf32>
    %103 = vector.extract_strided_slice %60 {offsets = [8, 0], sizes = [8, 768], strides = [1, 1]} : vector<16x768xf32> to vector<8x768xf32>
    %104 = vector.extract_strided_slice %6 {offsets = [1, 0, 0], sizes = [1, 1, 8], strides = [1, 1, 1]} : vector<2x1x8xf32> to vector<1x1x8xf32>
    %105 = vector.shape_cast %104 : vector<1x1x8xf32> to vector<1x8xf32>
    %106 = vector.extract_strided_slice %103 {offsets = [0, 0], sizes = [8, 128], strides = [1, 1]} : vector<8x768xf32> to vector<8x128xf32>
    %107 = vector.extract_strided_slice %103 {offsets = [0, 256], sizes = [8, 128], strides = [1, 1]} : vector<8x768xf32> to vector<8x128xf32>
    %108 = vector.extract_strided_slice %103 {offsets = [0, 512], sizes = [8, 128], strides = [1, 1]} : vector<8x768xf32> to vector<8x128xf32>
    %cst_31 = arith.constant dense<0.000000e+00> : vector<8x8xf32>
    %109 = tpu.matmul %106, %107, %cst_31 {dimension_numbers = #tpu.dot_dimension_numbers<[1], [1], [0], [0], [0, 0, 1, 0], [], []>} : vector<8x128xf32>, vector<8x128xf32>, vector<8x8xf32> -> vector<8x8xf32>
    %cst_32 = arith.constant 2.500000e-01 : f32
    %110 = vector.broadcast %cst_32 : f32 to vector<8x8xf32>
    %111 = arith.mulf %109, %110 : vector<8x8xf32>
    %112 = vector.broadcast %105 : vector<1x8xf32> to vector<8x8xf32>
    %113 = arith.addf %111, %112 : vector<8x8xf32>
    %cst_33 = arith.constant dense<0xFF800000> : vector<8xf32>
    %114 = vector.multi_reduction <maximumf>, %113, %cst_33 [1] : vector<8x8xf32> to vector<8xf32>
    %115 = vector.shape_cast %114 : vector<8xf32> to vector<8x1xf32>
    %116 = vector.broadcast %115 : vector<8x1xf32> to vector<8x8xf32>
    %117 = arith.subf %113, %116 : vector<8x8xf32>
    %118 = math.exp %117 : vector<8x8xf32>
    %cst_34 = arith.constant dense<0.000000e+00> : vector<8xf32>
    %119 = vector.multi_reduction <add>, %118, %cst_34 [1] : vector<8x8xf32> to vector<8xf32>
    %120 = vector.shape_cast %119 : vector<8xf32> to vector<8x1xf32>
    %121 = tpu.reciprocal %120 {approx = true} : vector<8x1xf32> -> vector<8x1xf32>
    %122 = vector.broadcast %121 : vector<8x1xf32> to vector<8x8xf32>
    %123 = arith.mulf %118, %122 : vector<8x8xf32>
    %cst_35 = arith.constant dense<0.000000e+00> : vector<8x128xf32>
    %124 = tpu.matmul %123, %108, %cst_35 {dimension_numbers = #tpu.dot_dimension_numbers<[1], [0], [0], [1], [0, 0, 1, 1], [], []>} : vector<8x8xf32>, vector<8x128xf32>, vector<8x128xf32> -> vector<8x128xf32>
    %125 = vector.extract_strided_slice %103 {offsets = [0, 128], sizes = [8, 128], strides = [1, 1]} : vector<8x768xf32> to vector<8x128xf32>
    %126 = vector.extract_strided_slice %103 {offsets = [0, 384], sizes = [8, 128], strides = [1, 1]} : vector<8x768xf32> to vector<8x128xf32>
    %127 = vector.extract_strided_slice %103 {offsets = [0, 640], sizes = [8, 128], strides = [1, 1]} : vector<8x768xf32> to vector<8x128xf32>
    %cst_36 = arith.constant dense<0.000000e+00> : vector<8x8xf32>
    %128 = tpu.matmul %125, %126, %cst_36 {dimension_numbers = #tpu.dot_dimension_numbers<[1], [1], [0], [0], [0, 0, 1, 0], [], []>} : vector<8x128xf32>, vector<8x128xf32>, vector<8x8xf32> -> vector<8x8xf32>
    %cst_37 = arith.constant 2.500000e-01 : f32
    %129 = vector.broadcast %cst_37 : f32 to vector<8x8xf32>
    %130 = arith.mulf %128, %129 : vector<8x8xf32>
    %131 = vector.broadcast %105 : vector<1x8xf32> to vector<8x8xf32>
    %132 = arith.addf %130, %131 : vector<8x8xf32>
    %cst_38 = arith.constant dense<0xFF800000> : vector<8xf32>
    %133 = vector.multi_reduction <maximumf>, %132, %cst_38 [1] : vector<8x8xf32> to vector<8xf32>
    %134 = vector.shape_cast %133 : vector<8xf32> to vector<8x1xf32>
    %135 = vector.broadcast %134 : vector<8x1xf32> to vector<8x8xf32>
    %136 = arith.subf %132, %135 : vector<8x8xf32>
    %137 = math.exp %136 : vector<8x8xf32>
    %cst_39 = arith.constant dense<0.000000e+00> : vector<8xf32>
    %138 = vector.multi_reduction <add>, %137, %cst_39 [1] : vector<8x8xf32> to vector<8xf32>
    %139 = vector.shape_cast %138 : vector<8xf32> to vector<8x1xf32>
    %140 = tpu.reciprocal %139 {approx = true} : vector<8x1xf32> -> vector<8x1xf32>
    %141 = vector.broadcast %140 : vector<8x1xf32> to vector<8x8xf32>
    %142 = arith.mulf %137, %141 : vector<8x8xf32>
    %cst_40 = arith.constant dense<0.000000e+00> : vector<8x128xf32>
    %143 = tpu.matmul %142, %127, %cst_40 {dimension_numbers = #tpu.dot_dimension_numbers<[1], [0], [0], [1], [0, 0, 1, 1], [], []>} : vector<8x8xf32>, vector<8x128xf32>, vector<8x128xf32> -> vector<8x128xf32>
    %144 = tpu.concatenate %124, %143 in 1 : vector<8x128xf32>, vector<8x128xf32> -> vector<8x256xf32>
    %145 = tpu.concatenate %102, %144 in 0 : vector<8x256xf32>, vector<8x256xf32> -> vector<16x256xf32>
    %cst_41 = arith.constant dense<0.000000e+00> : vector<16x32xf32>
    %146 = tpu.matmul %145, %56, %cst_41 {dimension_numbers = #tpu.dot_dimension_numbers<[1], [0], [0], [1], [0, 0, 1, 1], [], []>} : vector<16x256xf32>, vector<256x32xf32>, vector<16x32xf32> -> vector<16x32xf32>
    %147 = vector.broadcast %48 : vector<1x32xf32> to vector<16x32xf32>
    %148 = arith.addf %146, %147 : vector<16x32xf32>
    %149 = arith.addf %40, %148 : vector<16x32xf32>
    %cst_42 = arith.constant dense<0.000000e+00> : vector<16xf32>
    %150 = vector.multi_reduction <add>, %149, %cst_42 [1] : vector<16x32xf32> to vector<16xf32>
    %151 = vector.shape_cast %150 : vector<16xf32> to vector<16x1xf32>
    %cst_43 = arith.constant 3.200000e+01 : f32
    %152 = vector.broadcast %cst_43 : f32 to vector<16x1xf32>
    %153 = arith.divf %151, %152 : vector<16x1xf32>
    %154 = vector.broadcast %153 : vector<16x1xf32> to vector<16x32xf32>
    %155 = arith.subf %149, %154 : vector<16x32xf32>
    %156 = arith.mulf %155, %155 : vector<16x32xf32>
    %cst_44 = arith.constant dense<0.000000e+00> : vector<16xf32>
    %157 = vector.multi_reduction <add>, %156, %cst_44 [1] : vector<16x32xf32> to vector<16xf32>
    %158 = vector.shape_cast %157 : vector<16xf32> to vector<16x1xf32>
    %cst_45 = arith.constant 3.200000e+01 : f32
    %159 = vector.broadcast %cst_45 : f32 to vector<16x1xf32>
    %160 = arith.divf %158, %159 : vector<16x1xf32>
    %161 = vector.broadcast %153 : vector<16x1xf32> to vector<16x32xf32>
    %162 = arith.subf %149, %161 : vector<16x32xf32>
    %cst_46 = arith.constant 9.99999974E-6 : f32
    %163 = vector.broadcast %cst_46 : f32 to vector<16x1xf32>
    %164 = arith.addf %160, %163 : vector<16x1xf32>
    %165 = math.rsqrt %164 : vector<16x1xf32>
    %166 = vector.broadcast %165 : vector<16x1xf32> to vector<16x32xf32>
    %167 = arith.mulf %162, %166 : vector<16x32xf32>
    %168 = vector.broadcast %49 : vector<1x32xf32> to vector<16x32xf32>
    %169 = arith.mulf %167, %168 : vector<16x32xf32>
    %170 = vector.broadcast %50 : vector<1x32xf32> to vector<16x32xf32>
    %171 = arith.addf %169, %170 : vector<16x32xf32>
    %cst_47 = arith.constant dense<0.000000e+00> : vector<16x128xf32>
    %172 = tpu.matmul %171, %44, %cst_47 {dimension_numbers = #tpu.dot_dimension_numbers<[1], [0], [0], [1], [0, 0, 1, 1], [], []>} : vector<16x32xf32>, vector<32x128xf32>, vector<16x128xf32> -> vector<16x128xf32>
    %173 = vector.broadcast %47 : vector<1x128xf32> to vector<16x128xf32>
    %174 = arith.addf %172, %173 : vector<16x128xf32>
    %175 = arith.mulf %174, %174 : vector<16x128xf32>
    %176 = arith.mulf %174, %175 : vector<16x128xf32>
    %cst_48 = arith.constant 4.471500e-02 : f32
    %177 = vector.broadcast %cst_48 : f32 to vector<16x128xf32>
    %178 = arith.mulf %177, %176 : vector<16x128xf32>
    %179 = arith.addf %174, %178 : vector<16x128xf32>
    %cst_49 = arith.constant 0.797884583 : f32
    %180 = vector.broadcast %cst_49 : f32 to vector<16x128xf32>
    %181 = arith.mulf %180, %179 : vector<16x128xf32>
    %182 = math.tanh %181 : vector<16x128xf32>
    %cst_50 = arith.constant 1.000000e+00 : f32
    %183 = vector.broadcast %cst_50 : f32 to vector<16x128xf32>
    %184 = arith.addf %183, %182 : vector<16x128xf32>
    %cst_51 = arith.constant 5.000000e-01 : f32
    %185 = vector.broadcast %cst_51 : f32 to vector<16x128xf32>
    %186 = arith.mulf %185, %184 : vector<16x128xf32>
    %187 = arith.mulf %174, %186 : vector<16x128xf32>
    %cst_52 = arith.constant dense<0.000000e+00> : vector<16x32xf32>
    %188 = tpu.matmul %187, %57, %cst_52 {dimension_numbers = #tpu.dot_dimension_numbers<[1], [0], [0], [1], [0, 0, 1, 1], [], []>} : vector<16x128xf32>, vector<128x32xf32>, vector<16x32xf32> -> vector<16x32xf32>
    %189 = vector.broadcast %51 : vector<1x32xf32> to vector<16x32xf32>
    %190 = arith.addf %188, %189 : vector<16x32xf32>
    %191 = arith.addf %171, %190 : vector<16x32xf32>
    %cst_53 = arith.constant dense<0.000000e+00> : vector<16xf32>
    %192 = vector.multi_reduction <add>, %191, %cst_53 [1] : vector<16x32xf32> to vector<16xf32>
    %193 = vector.shape_cast %192 : vector<16xf32> to vector<16x1xf32>
    %cst_54 = arith.constant 3.200000e+01 : f32
    %194 = vector.broadcast %cst_54 : f32 to vector<16x1xf32>
    %195 = arith.divf %193, %194 : vector<16x1xf32>
    %196 = vector.broadcast %195 : vector<16x1xf32> to vector<16x32xf32>
    %197 = arith.subf %191, %196 : vector<16x32xf32>
    %198 = arith.mulf %197, %197 : vector<16x32xf32>
    %cst_55 = arith.constant dense<0.000000e+00> : vector<16xf32>
    %199 = vector.multi_reduction <add>, %198, %cst_55 [1] : vector<16x32xf32> to vector<16xf32>
    %200 = vector.shape_cast %199 : vector<16xf32> to vector<16x1xf32>
    %cst_56 = arith.constant 3.200000e+01 : f32
    %201 = vector.broadcast %cst_56 : f32 to vector<16x1xf32>
    %202 = arith.divf %200, %201 : vector<16x1xf32>
    %203 = vector.broadcast %195 : vector<16x1xf32> to vector<16x32xf32>
    %204 = arith.subf %191, %203 : vector<16x32xf32>
    %cst_57 = arith.constant 9.99999974E-6 : f32
    %205 = vector.broadcast %cst_57 : f32 to vector<16x1xf32>
    %206 = arith.addf %202, %205 : vector<16x1xf32>
    %207 = math.rsqrt %206 : vector<16x1xf32>
    %208 = vector.broadcast %207 : vector<16x1xf32> to vector<16x32xf32>
    %209 = arith.mulf %204, %208 : vector<16x32xf32>
    %210 = vector.broadcast %52 : vector<1x32xf32> to vector<16x32xf32>
    %211 = arith.mulf %209, %210 : vector<16x32xf32>
    %212 = vector.broadcast %53 : vector<1x32xf32> to vector<16x32xf32>
    %213 = arith.addf %211, %212 : vector<16x32xf32>
    %c1 = arith.constant 1 : index
    %c0_58 = arith.constant 0 : index
    %c0_59 = arith.constant 0 : index
    %214 = vector.load %arg3[%c1, %c0_58, %c0_59] : memref<2x40x1024xf32, #tpu.memory_space<vmem>>, vector<1x40x1024xf32>
    %215 = vector.shape_cast %214 : vector<1x40x1024xf32> to vector<40x1024xf32>
    %216 = vector.extract_strided_slice %215 {offsets = [0, 0], sizes = [32, 768], strides = [1, 1]} : vector<40x1024xf32> to vector<32x768xf32>
    %217 = vector.extract_strided_slice %215 {offsets = [0, 768], sizes = [32, 128], strides = [1, 1]} : vector<40x1024xf32> to vector<32x128xf32>
    %218 = vector.extract_strided_slice %215 {offsets = [32, 0], sizes = [1, 1024], strides = [1, 1]} : vector<40x1024xf32> to vector<1x1024xf32>
    %219 = vector.extract_strided_slice %218 {offsets = [0, 0], sizes = [1, 768], strides = [1, 1]} : vector<1x1024xf32> to vector<1x768xf32>
    %220 = vector.extract_strided_slice %218 {offsets = [0, 768], sizes = [1, 128], strides = [1, 1]} : vector<1x1024xf32> to vector<1x128xf32>
    %221 = vector.extract_strided_slice %215 {offsets = [33, 0], sizes = [1, 32], strides = [1, 1]} : vector<40x1024xf32> to vector<1x32xf32>
    %222 = vector.extract_strided_slice %215 {offsets = [34, 0], sizes = [1, 32], strides = [1, 1]} : vector<40x1024xf32> to vector<1x32xf32>
    %223 = vector.extract_strided_slice %215 {offsets = [35, 0], sizes = [1, 32], strides = [1, 1]} : vector<40x1024xf32> to vector<1x32xf32>
    %224 = vector.extract_strided_slice %215 {offsets = [36, 0], sizes = [1, 32], strides = [1, 1]} : vector<40x1024xf32> to vector<1x32xf32>
    %225 = vector.extract_strided_slice %215 {offsets = [37, 0], sizes = [1, 32], strides = [1, 1]} : vector<40x1024xf32> to vector<1x32xf32>
    %226 = vector.extract_strided_slice %215 {offsets = [38, 0], sizes = [1, 32], strides = [1, 1]} : vector<40x1024xf32> to vector<1x32xf32>
    %c1_60 = arith.constant 1 : index
    %c0_61 = arith.constant 0 : index
    %c0_62 = arith.constant 0 : index
    %227 = vector.load %arg4[%c1_60, %c0_61, %c0_62] : memref<2x416x32xf32, #tpu.memory_space<vmem>>, vector<1x416x32xf32>
    %228 = vector.shape_cast %227 : vector<1x416x32xf32> to vector<416x32xf32>
    %229 = vector.extract_strided_slice %228 {offsets = [0, 0], sizes = [256, 32], strides = [1, 1]} : vector<416x32xf32> to vector<256x32xf32>
    %230 = vector.extract_strided_slice %228 {offsets = [256, 0], sizes = [128, 32], strides = [1, 1]} : vector<416x32xf32> to vector<128x32xf32>
    %cst_63 = arith.constant dense<0.000000e+00> : vector<16x768xf32>
    %231 = tpu.matmul %213, %216, %cst_63 {dimension_numbers = #tpu.dot_dimension_numbers<[1], [0], [0], [1], [0, 0, 1, 1], [], []>} : vector<16x32xf32>, vector<32x768xf32>, vector<16x768xf32> -> vector<16x768xf32>
    %232 = vector.broadcast %219 : vector<1x768xf32> to vector<16x768xf32>
    %233 = arith.addf %231, %232 : vector<16x768xf32>
    %234 = vector.extract_strided_slice %233 {offsets = [0, 0], sizes = [8, 768], strides = [1, 1]} : vector<16x768xf32> to vector<8x768xf32>
    %235 = vector.extract_strided_slice %6 {offsets = [0, 0, 0], sizes = [1, 1, 8], strides = [1, 1, 1]} : vector<2x1x8xf32> to vector<1x1x8xf32>
    %236 = vector.shape_cast %235 : vector<1x1x8xf32> to vector<1x8xf32>
    %237 = vector.extract_strided_slice %234 {offsets = [0, 0], sizes = [8, 128], strides = [1, 1]} : vector<8x768xf32> to vector<8x128xf32>
    %238 = vector.extract_strided_slice %234 {offsets = [0, 256], sizes = [8, 128], strides = [1, 1]} : vector<8x768xf32> to vector<8x128xf32>
    %239 = vector.extract_strided_slice %234 {offsets = [0, 512], sizes = [8, 128], strides = [1, 1]} : vector<8x768xf32> to vector<8x128xf32>
    %cst_64 = arith.constant dense<0.000000e+00> : vector<8x8xf32>
    %240 = tpu.matmul %237, %238, %cst_64 {dimension_numbers = #tpu.dot_dimension_numbers<[1], [1], [0], [0], [0, 0, 1, 0], [], []>} : vector<8x128xf32>, vector<8x128xf32>, vector<8x8xf32> -> vector<8x8xf32>
    %cst_65 = arith.constant 2.500000e-01 : f32
    %241 = vector.broadcast %cst_65 : f32 to vector<8x8xf32>
    %242 = arith.mulf %240, %241 : vector<8x8xf32>
    %243 = vector.broadcast %236 : vector<1x8xf32> to vector<8x8xf32>
    %244 = arith.addf %242, %243 : vector<8x8xf32>
    %cst_66 = arith.constant dense<0xFF800000> : vector<8xf32>
    %245 = vector.multi_reduction <maximumf>, %244, %cst_66 [1] : vector<8x8xf32> to vector<8xf32>
    %246 = vector.shape_cast %245 : vector<8xf32> to vector<8x1xf32>
    %247 = vector.broadcast %246 : vector<8x1xf32> to vector<8x8xf32>
    %248 = arith.subf %244, %247 : vector<8x8xf32>
    %249 = math.exp %248 : vector<8x8xf32>
    %cst_67 = arith.constant dense<0.000000e+00> : vector<8xf32>
    %250 = vector.multi_reduction <add>, %249, %cst_67 [1] : vector<8x8xf32> to vector<8xf32>
    %251 = vector.shape_cast %250 : vector<8xf32> to vector<8x1xf32>
    %252 = tpu.reciprocal %251 {approx = true} : vector<8x1xf32> -> vector<8x1xf32>
    %253 = vector.broadcast %252 : vector<8x1xf32> to vector<8x8xf32>
    %254 = arith.mulf %249, %253 : vector<8x8xf32>
    %cst_68 = arith.constant dense<0.000000e+00> : vector<8x128xf32>
    %255 = tpu.matmul %254, %239, %cst_68 {dimension_numbers = #tpu.dot_dimension_numbers<[1], [0], [0], [1], [0, 0, 1, 1], [], []>} : vector<8x8xf32>, vector<8x128xf32>, vector<8x128xf32> -> vector<8x128xf32>
    %256 = vector.extract_strided_slice %234 {offsets = [0, 128], sizes = [8, 128], strides = [1, 1]} : vector<8x768xf32> to vector<8x128xf32>
    %257 = vector.extract_strided_slice %234 {offsets = [0, 384], sizes = [8, 128], strides = [1, 1]} : vector<8x768xf32> to vector<8x128xf32>
    %258 = vector.extract_strided_slice %234 {offsets = [0, 640], sizes = [8, 128], strides = [1, 1]} : vector<8x768xf32> to vector<8x128xf32>
    %cst_69 = arith.constant dense<0.000000e+00> : vector<8x8xf32>
    %259 = tpu.matmul %256, %257, %cst_69 {dimension_numbers = #tpu.dot_dimension_numbers<[1], [1], [0], [0], [0, 0, 1, 0], [], []>} : vector<8x128xf32>, vector<8x128xf32>, vector<8x8xf32> -> vector<8x8xf32>
    %cst_70 = arith.constant 2.500000e-01 : f32
    %260 = vector.broadcast %cst_70 : f32 to vector<8x8xf32>
    %261 = arith.mulf %259, %260 : vector<8x8xf32>
    %262 = vector.broadcast %236 : vector<1x8xf32> to vector<8x8xf32>
    %263 = arith.addf %261, %262 : vector<8x8xf32>
    %cst_71 = arith.constant dense<0xFF800000> : vector<8xf32>
    %264 = vector.multi_reduction <maximumf>, %263, %cst_71 [1] : vector<8x8xf32> to vector<8xf32>
    %265 = vector.shape_cast %264 : vector<8xf32> to vector<8x1xf32>
    %266 = vector.broadcast %265 : vector<8x1xf32> to vector<8x8xf32>
    %267 = arith.subf %263, %266 : vector<8x8xf32>
    %268 = math.exp %267 : vector<8x8xf32>
    %cst_72 = arith.constant dense<0.000000e+00> : vector<8xf32>
    %269 = vector.multi_reduction <add>, %268, %cst_72 [1] : vector<8x8xf32> to vector<8xf32>
    %270 = vector.shape_cast %269 : vector<8xf32> to vector<8x1xf32>
    %271 = tpu.reciprocal %270 {approx = true} : vector<8x1xf32> -> vector<8x1xf32>
    %272 = vector.broadcast %271 : vector<8x1xf32> to vector<8x8xf32>
    %273 = arith.mulf %268, %272 : vector<8x8xf32>
    %cst_73 = arith.constant dense<0.000000e+00> : vector<8x128xf32>
    %274 = tpu.matmul %273, %258, %cst_73 {dimension_numbers = #tpu.dot_dimension_numbers<[1], [0], [0], [1], [0, 0, 1, 1], [], []>} : vector<8x8xf32>, vector<8x128xf32>, vector<8x128xf32> -> vector<8x128xf32>
    %275 = tpu.concatenate %255, %274 in 1 : vector<8x128xf32>, vector<8x128xf32> -> vector<8x256xf32>
    %276 = vector.extract_strided_slice %233 {offsets = [8, 0], sizes = [8, 768], strides = [1, 1]} : vector<16x768xf32> to vector<8x768xf32>
    %277 = vector.extract_strided_slice %6 {offsets = [1, 0, 0], sizes = [1, 1, 8], strides = [1, 1, 1]} : vector<2x1x8xf32> to vector<1x1x8xf32>
    %278 = vector.shape_cast %277 : vector<1x1x8xf32> to vector<1x8xf32>
    %279 = vector.extract_strided_slice %276 {offsets = [0, 0], sizes = [8, 128], strides = [1, 1]} : vector<8x768xf32> to vector<8x128xf32>
    %280 = vector.extract_strided_slice %276 {offsets = [0, 256], sizes = [8, 128], strides = [1, 1]} : vector<8x768xf32> to vector<8x128xf32>
    %281 = vector.extract_strided_slice %276 {offsets = [0, 512], sizes = [8, 128], strides = [1, 1]} : vector<8x768xf32> to vector<8x128xf32>
    %cst_74 = arith.constant dense<0.000000e+00> : vector<8x8xf32>
    %282 = tpu.matmul %279, %280, %cst_74 {dimension_numbers = #tpu.dot_dimension_numbers<[1], [1], [0], [0], [0, 0, 1, 0], [], []>} : vector<8x128xf32>, vector<8x128xf32>, vector<8x8xf32> -> vector<8x8xf32>
    %cst_75 = arith.constant 2.500000e-01 : f32
    %283 = vector.broadcast %cst_75 : f32 to vector<8x8xf32>
    %284 = arith.mulf %282, %283 : vector<8x8xf32>
    %285 = vector.broadcast %278 : vector<1x8xf32> to vector<8x8xf32>
    %286 = arith.addf %284, %285 : vector<8x8xf32>
    %cst_76 = arith.constant dense<0xFF800000> : vector<8xf32>
    %287 = vector.multi_reduction <maximumf>, %286, %cst_76 [1] : vector<8x8xf32> to vector<8xf32>
    %288 = vector.shape_cast %287 : vector<8xf32> to vector<8x1xf32>
    %289 = vector.broadcast %288 : vector<8x1xf32> to vector<8x8xf32>
    %290 = arith.subf %286, %289 : vector<8x8xf32>
    %291 = math.exp %290 : vector<8x8xf32>
    %cst_77 = arith.constant dense<0.000000e+00> : vector<8xf32>
    %292 = vector.multi_reduction <add>, %291, %cst_77 [1] : vector<8x8xf32> to vector<8xf32>
    %293 = vector.shape_cast %292 : vector<8xf32> to vector<8x1xf32>
    %294 = tpu.reciprocal %293 {approx = true} : vector<8x1xf32> -> vector<8x1xf32>
    %295 = vector.broadcast %294 : vector<8x1xf32> to vector<8x8xf32>
    %296 = arith.mulf %291, %295 : vector<8x8xf32>
    %cst_78 = arith.constant dense<0.000000e+00> : vector<8x128xf32>
    %297 = tpu.matmul %296, %281, %cst_78 {dimension_numbers = #tpu.dot_dimension_numbers<[1], [0], [0], [1], [0, 0, 1, 1], [], []>} : vector<8x8xf32>, vector<8x128xf32>, vector<8x128xf32> -> vector<8x128xf32>
    %298 = vector.extract_strided_slice %276 {offsets = [0, 128], sizes = [8, 128], strides = [1, 1]} : vector<8x768xf32> to vector<8x128xf32>
    %299 = vector.extract_strided_slice %276 {offsets = [0, 384], sizes = [8, 128], strides = [1, 1]} : vector<8x768xf32> to vector<8x128xf32>
    %300 = vector.extract_strided_slice %276 {offsets = [0, 640], sizes = [8, 128], strides = [1, 1]} : vector<8x768xf32> to vector<8x128xf32>
    %cst_79 = arith.constant dense<0.000000e+00> : vector<8x8xf32>
    %301 = tpu.matmul %298, %299, %cst_79 {dimension_numbers = #tpu.dot_dimension_numbers<[1], [1], [0], [0], [0, 0, 1, 0], [], []>} : vector<8x128xf32>, vector<8x128xf32>, vector<8x8xf32> -> vector<8x8xf32>
    %cst_80 = arith.constant 2.500000e-01 : f32
    %302 = vector.broadcast %cst_80 : f32 to vector<8x8xf32>
    %303 = arith.mulf %301, %302 : vector<8x8xf32>
    %304 = vector.broadcast %278 : vector<1x8xf32> to vector<8x8xf32>
    %305 = arith.addf %303, %304 : vector<8x8xf32>
    %cst_81 = arith.constant dense<0xFF800000> : vector<8xf32>
    %306 = vector.multi_reduction <maximumf>, %305, %cst_81 [1] : vector<8x8xf32> to vector<8xf32>
    %307 = vector.shape_cast %306 : vector<8xf32> to vector<8x1xf32>
    %308 = vector.broadcast %307 : vector<8x1xf32> to vector<8x8xf32>
    %309 = arith.subf %305, %308 : vector<8x8xf32>
    %310 = math.exp %309 : vector<8x8xf32>
    %cst_82 = arith.constant dense<0.000000e+00> : vector<8xf32>
    %311 = vector.multi_reduction <add>, %310, %cst_82 [1] : vector<8x8xf32> to vector<8xf32>
    %312 = vector.shape_cast %311 : vector<8xf32> to vector<8x1xf32>
    %313 = tpu.reciprocal %312 {approx = true} : vector<8x1xf32> -> vector<8x1xf32>
    %314 = vector.broadcast %313 : vector<8x1xf32> to vector<8x8xf32>
    %315 = arith.mulf %310, %314 : vector<8x8xf32>
    %cst_83 = arith.constant dense<0.000000e+00> : vector<8x128xf32>
    %316 = tpu.matmul %315, %300, %cst_83 {dimension_numbers = #tpu.dot_dimension_numbers<[1], [0], [0], [1], [0, 0, 1, 1], [], []>} : vector<8x8xf32>, vector<8x128xf32>, vector<8x128xf32> -> vector<8x128xf32>
    %317 = tpu.concatenate %297, %316 in 1 : vector<8x128xf32>, vector<8x128xf32> -> vector<8x256xf32>
    %318 = tpu.concatenate %275, %317 in 0 : vector<8x256xf32>, vector<8x256xf32> -> vector<16x256xf32>
    %cst_84 = arith.constant dense<0.000000e+00> : vector<16x32xf32>
    %319 = tpu.matmul %318, %229, %cst_84 {dimension_numbers = #tpu.dot_dimension_numbers<[1], [0], [0], [1], [0, 0, 1, 1], [], []>} : vector<16x256xf32>, vector<256x32xf32>, vector<16x32xf32> -> vector<16x32xf32>
    %320 = vector.broadcast %221 : vector<1x32xf32> to vector<16x32xf32>
    %321 = arith.addf %319, %320 : vector<16x32xf32>
    %322 = arith.addf %213, %321 : vector<16x32xf32>
    %cst_85 = arith.constant dense<0.000000e+00> : vector<16xf32>
    %323 = vector.multi_reduction <add>, %322, %cst_85 [1] : vector<16x32xf32> to vector<16xf32>
    %324 = vector.shape_cast %323 : vector<16xf32> to vector<16x1xf32>
    %cst_86 = arith.constant 3.200000e+01 : f32
    %325 = vector.broadcast %cst_86 : f32 to vector<16x1xf32>
    %326 = arith.divf %324, %325 : vector<16x1xf32>
    %327 = vector.broadcast %326 : vector<16x1xf32> to vector<16x32xf32>
    %328 = arith.subf %322, %327 : vector<16x32xf32>
    %329 = arith.mulf %328, %328 : vector<16x32xf32>
    %cst_87 = arith.constant dense<0.000000e+00> : vector<16xf32>
    %330 = vector.multi_reduction <add>, %329, %cst_87 [1] : vector<16x32xf32> to vector<16xf32>
    %331 = vector.shape_cast %330 : vector<16xf32> to vector<16x1xf32>
    %cst_88 = arith.constant 3.200000e+01 : f32
    %332 = vector.broadcast %cst_88 : f32 to vector<16x1xf32>
    %333 = arith.divf %331, %332 : vector<16x1xf32>
    %334 = vector.broadcast %326 : vector<16x1xf32> to vector<16x32xf32>
    %335 = arith.subf %322, %334 : vector<16x32xf32>
    %cst_89 = arith.constant 9.99999974E-6 : f32
    %336 = vector.broadcast %cst_89 : f32 to vector<16x1xf32>
    %337 = arith.addf %333, %336 : vector<16x1xf32>
    %338 = math.rsqrt %337 : vector<16x1xf32>
    %339 = vector.broadcast %338 : vector<16x1xf32> to vector<16x32xf32>
    %340 = arith.mulf %335, %339 : vector<16x32xf32>
    %341 = vector.broadcast %222 : vector<1x32xf32> to vector<16x32xf32>
    %342 = arith.mulf %340, %341 : vector<16x32xf32>
    %343 = vector.broadcast %223 : vector<1x32xf32> to vector<16x32xf32>
    %344 = arith.addf %342, %343 : vector<16x32xf32>
    %cst_90 = arith.constant dense<0.000000e+00> : vector<16x128xf32>
    %345 = tpu.matmul %344, %217, %cst_90 {dimension_numbers = #tpu.dot_dimension_numbers<[1], [0], [0], [1], [0, 0, 1, 1], [], []>} : vector<16x32xf32>, vector<32x128xf32>, vector<16x128xf32> -> vector<16x128xf32>
    %346 = vector.broadcast %220 : vector<1x128xf32> to vector<16x128xf32>
    %347 = arith.addf %345, %346 : vector<16x128xf32>
    %348 = arith.mulf %347, %347 : vector<16x128xf32>
    %349 = arith.mulf %347, %348 : vector<16x128xf32>
    %cst_91 = arith.constant 4.471500e-02 : f32
    %350 = vector.broadcast %cst_91 : f32 to vector<16x128xf32>
    %351 = arith.mulf %350, %349 : vector<16x128xf32>
    %352 = arith.addf %347, %351 : vector<16x128xf32>
    %cst_92 = arith.constant 0.797884583 : f32
    %353 = vector.broadcast %cst_92 : f32 to vector<16x128xf32>
    %354 = arith.mulf %353, %352 : vector<16x128xf32>
    %355 = math.tanh %354 : vector<16x128xf32>
    %cst_93 = arith.constant 1.000000e+00 : f32
    %356 = vector.broadcast %cst_93 : f32 to vector<16x128xf32>
    %357 = arith.addf %356, %355 : vector<16x128xf32>
    %cst_94 = arith.constant 5.000000e-01 : f32
    %358 = vector.broadcast %cst_94 : f32 to vector<16x128xf32>
    %359 = arith.mulf %358, %357 : vector<16x128xf32>
    %360 = arith.mulf %347, %359 : vector<16x128xf32>
    %cst_95 = arith.constant dense<0.000000e+00> : vector<16x32xf32>
    %361 = tpu.matmul %360, %230, %cst_95 {dimension_numbers = #tpu.dot_dimension_numbers<[1], [0], [0], [1], [0, 0, 1, 1], [], []>} : vector<16x128xf32>, vector<128x32xf32>, vector<16x32xf32> -> vector<16x32xf32>
    %362 = vector.broadcast %224 : vector<1x32xf32> to vector<16x32xf32>
    %363 = arith.addf %361, %362 : vector<16x32xf32>
    %364 = arith.addf %344, %363 : vector<16x32xf32>
    %cst_96 = arith.constant dense<0.000000e+00> : vector<16xf32>
    %365 = vector.multi_reduction <add>, %364, %cst_96 [1] : vector<16x32xf32> to vector<16xf32>
    %366 = vector.shape_cast %365 : vector<16xf32> to vector<16x1xf32>
    %cst_97 = arith.constant 3.200000e+01 : f32
    %367 = vector.broadcast %cst_97 : f32 to vector<16x1xf32>
    %368 = arith.divf %366, %367 : vector<16x1xf32>
    %369 = vector.broadcast %368 : vector<16x1xf32> to vector<16x32xf32>
    %370 = arith.subf %364, %369 : vector<16x32xf32>
    %371 = arith.mulf %370, %370 : vector<16x32xf32>
    %cst_98 = arith.constant dense<0.000000e+00> : vector<16xf32>
    %372 = vector.multi_reduction <add>, %371, %cst_98 [1] : vector<16x32xf32> to vector<16xf32>
    %373 = vector.shape_cast %372 : vector<16xf32> to vector<16x1xf32>
    %cst_99 = arith.constant 3.200000e+01 : f32
    %374 = vector.broadcast %cst_99 : f32 to vector<16x1xf32>
    %375 = arith.divf %373, %374 : vector<16x1xf32>
    %376 = vector.broadcast %368 : vector<16x1xf32> to vector<16x32xf32>
    %377 = arith.subf %364, %376 : vector<16x32xf32>
    %cst_100 = arith.constant 9.99999974E-6 : f32
    %378 = vector.broadcast %cst_100 : f32 to vector<16x1xf32>
    %379 = arith.addf %375, %378 : vector<16x1xf32>
    %380 = math.rsqrt %379 : vector<16x1xf32>
    %381 = vector.broadcast %380 : vector<16x1xf32> to vector<16x32xf32>
    %382 = arith.mulf %377, %381 : vector<16x32xf32>
    %383 = vector.broadcast %225 : vector<1x32xf32> to vector<16x32xf32>
    %384 = arith.mulf %382, %383 : vector<16x32xf32>
    %385 = vector.broadcast %226 : vector<1x32xf32> to vector<16x32xf32>
    %386 = arith.addf %384, %385 : vector<16x32xf32>
    %c0_101 = arith.constant 0 : index
    %c0_102 = arith.constant 0 : index
    %c0_103 = arith.constant 0 : index
    %387 = vector.load %arg4[%c0_101, %c0_102, %c0_103] : memref<2x416x32xf32, #tpu.memory_space<vmem>>, vector<1x416x32xf32>
    %388 = vector.shape_cast %387 : vector<1x416x32xf32> to vector<416x32xf32>
    %389 = vector.extract_strided_slice %388 {offsets = [384, 0], sizes = [32, 32], strides = [1, 1]} : vector<416x32xf32> to vector<32x32xf32>
    %c0_104 = arith.constant 0 : index
    %c0_105 = arith.constant 0 : index
    %c0_106 = arith.constant 0 : index
    %390 = vector.load %arg3[%c0_104, %c0_105, %c0_106] : memref<2x40x1024xf32, #tpu.memory_space<vmem>>, vector<1x40x1024xf32>
    %391 = vector.shape_cast %390 : vector<1x40x1024xf32> to vector<40x1024xf32>
    %392 = vector.extract_strided_slice %391 {offsets = [0, 896], sizes = [32, 128], strides = [1, 1]} : vector<40x1024xf32> to vector<32x128xf32>
    %cst_107 = arith.constant dense<0.000000e+00> : vector<16x32xf32>
    %393 = tpu.matmul %386, %389, %cst_107 {dimension_numbers = #tpu.dot_dimension_numbers<[1], [0], [0], [1], [0, 0, 1, 1], [], []>} : vector<16x32xf32>, vector<32x32xf32>, vector<16x32xf32> -> vector<16x32xf32>
    %394 = vector.broadcast %11 : vector<1x32xf32> to vector<16x32xf32>
    %395 = arith.addf %393, %394 : vector<16x32xf32>
    %396 = arith.mulf %395, %395 : vector<16x32xf32>
    %397 = arith.mulf %395, %396 : vector<16x32xf32>
    %cst_108 = arith.constant 4.471500e-02 : f32
    %398 = vector.broadcast %cst_108 : f32 to vector<16x32xf32>
    %399 = arith.mulf %398, %397 : vector<16x32xf32>
    %400 = arith.addf %395, %399 : vector<16x32xf32>
    %cst_109 = arith.constant 0.797884583 : f32
    %401 = vector.broadcast %cst_109 : f32 to vector<16x32xf32>
    %402 = arith.mulf %401, %400 : vector<16x32xf32>
    %403 = math.tanh %402 : vector<16x32xf32>
    %cst_110 = arith.constant 1.000000e+00 : f32
    %404 = vector.broadcast %cst_110 : f32 to vector<16x32xf32>
    %405 = arith.addf %404, %403 : vector<16x32xf32>
    %cst_111 = arith.constant 5.000000e-01 : f32
    %406 = vector.broadcast %cst_111 : f32 to vector<16x32xf32>
    %407 = arith.mulf %406, %405 : vector<16x32xf32>
    %408 = arith.mulf %395, %407 : vector<16x32xf32>
    %cst_112 = arith.constant dense<0.000000e+00> : vector<16xf32>
    %409 = vector.multi_reduction <add>, %408, %cst_112 [1] : vector<16x32xf32> to vector<16xf32>
    %410 = vector.shape_cast %409 : vector<16xf32> to vector<16x1xf32>
    %cst_113 = arith.constant 3.200000e+01 : f32
    %411 = vector.broadcast %cst_113 : f32 to vector<16x1xf32>
    %412 = arith.divf %410, %411 : vector<16x1xf32>
    %413 = vector.broadcast %412 : vector<16x1xf32> to vector<16x32xf32>
    %414 = arith.subf %408, %413 : vector<16x32xf32>
    %415 = arith.mulf %414, %414 : vector<16x32xf32>
    %cst_114 = arith.constant dense<0.000000e+00> : vector<16xf32>
    %416 = vector.multi_reduction <add>, %415, %cst_114 [1] : vector<16x32xf32> to vector<16xf32>
    %417 = vector.shape_cast %416 : vector<16xf32> to vector<16x1xf32>
    %cst_115 = arith.constant 3.200000e+01 : f32
    %418 = vector.broadcast %cst_115 : f32 to vector<16x1xf32>
    %419 = arith.divf %417, %418 : vector<16x1xf32>
    %420 = vector.broadcast %412 : vector<16x1xf32> to vector<16x32xf32>
    %421 = arith.subf %408, %420 : vector<16x32xf32>
    %cst_116 = arith.constant 9.99999974E-6 : f32
    %422 = vector.broadcast %cst_116 : f32 to vector<16x1xf32>
    %423 = arith.addf %419, %422 : vector<16x1xf32>
    %424 = math.rsqrt %423 : vector<16x1xf32>
    %425 = vector.broadcast %424 : vector<16x1xf32> to vector<16x32xf32>
    %426 = arith.mulf %421, %425 : vector<16x32xf32>
    %427 = vector.broadcast %12 : vector<1x32xf32> to vector<16x32xf32>
    %428 = arith.mulf %426, %427 : vector<16x32xf32>
    %429 = vector.broadcast %13 : vector<1x32xf32> to vector<16x32xf32>
    %430 = arith.addf %428, %429 : vector<16x32xf32>
    %cst_117 = arith.constant dense<0.000000e+00> : vector<16x128xf32>
    %431 = tpu.matmul %430, %392, %cst_117 {dimension_numbers = #tpu.dot_dimension_numbers<[1], [0], [0], [1], [0, 0, 1, 1], [], []>} : vector<16x32xf32>, vector<32x128xf32>, vector<16x128xf32> -> vector<16x128xf32>
    %432 = vector.broadcast %14 : vector<1x128xf32> to vector<16x128xf32>
    %433 = arith.addf %431, %432 : vector<16x128xf32>
    %434 = vector.shape_cast %433 : vector<16x128xf32> to vector<2x8x128xf32>
    %c0_118 = arith.constant 0 : index
    %c0_119 = arith.constant 0 : index
    %c0_120 = arith.constant 0 : index
    %435 = vector.load %arg6[%c0_118, %c0_119, %c0_120] : memref<2x8x128xf32, #tpu.memory_space<vmem>>, vector<2x8x128xf32>
    tpu.vector_store %arg6[%c0_118, %c0_119, %c0_120], %434 {strides = array<i32>} : memref<2x8x128xf32, #tpu.memory_space<vmem>>, vector<2x8x128xf32>,
    return
  }
  func.func @transform_0(%arg0: i32) -> (i32, i32, i32) {
    %c0_i32 = arith.constant 0 : i32
    %c0_i32_0 = arith.constant 0 : i32
    %c0_i32_1 = arith.constant 0 : i32
    %c0_i32_2 = arith.constant 0 : i32
    return %c0_i32, %c0_i32_0, %c0_i32_1 : i32, i32, i32
  }
  func.func @transform_1(%arg0: i32) -> (i32, i32, i32) {
    %c0_i32 = arith.constant 0 : i32
    %c0_i32_0 = arith.constant 0 : i32
    %c0_i32_1 = arith.constant 0 : i32
    %c0_i32_2 = arith.constant 0 : i32
    return %c0_i32, %c0_i32_0, %c0_i32_1 : i32, i32, i32
  }
  func.func @transform_2(%arg0: i32) -> (i32, i32, i32) {
    %c0_i32 = arith.constant 0 : i32
    %c0_i32_0 = arith.constant 0 : i32
    %c0_i32_1 = arith.constant 0 : i32
    %c0_i32_2 = arith.constant 0 : i32
    return %c0_i32, %c0_i32_0, %c0_i32_1 : i32, i32, i32
  }
  func.func @transform_3(%arg0: i32) -> (i32, i32, i32) {
    %c0_i32 = arith.constant 0 : i32
    %c0_i32_0 = arith.constant 0 : i32
    %c0_i32_1 = arith.constant 0 : i32
    %c0_i32_2 = arith.constant 0 : i32
    return %c0_i32, %c0_i32_0, %c0_i32_1 : i32, i32, i32
  }
  func.func @transform_4(%arg0: i32) -> (i32, i32) {
    %c0_i32 = arith.constant 0 : i32
    %c0_i32_0 = arith.constant 0 : i32
    %c0_i32_1 = arith.constant 0 : i32
    return %c0_i32, %c0_i32_0 : i32, i32
  }
  func.func @transform_5(%arg0: i32) -> (i32, i32, i32) {
    %c0_i32 = arith.constant 0 : i32
    %c0_i32_0 = arith.constant 0 : i32
    %c0_i32_1 = arith.constant 0 : i32
    %c0_i32_2 = arith.constant 0 : i32
    return %c0_i32, %c0_i32_0, %c0_i32_1 : i32, i32, i32
  }
}

</mosaic_0001>

<bundles_post_ra>
// kernel: tpu_custom_call.1
= control target key start
LH: loop header
LB: loop body
LE: loop exit
PB: predicated region body
PF: predicated region fallthrough
CT: control target
= control target key end

     0   :  { %vm33_vm0 = vcmask 261120   ;;  %s4654_s0 = inlined_call_operand.vmem [shape: f32[2,8,32], index: 0, kind: input, shape index: {}]   ;;  %s4655_s1 = inlined_call_operand.vmem [shape: f32[2,1,8], index: 1, kind: input, shape index: {}]   ;;  %s4656_s2 = inlined_call_operand.vmem [shape: f32[2,40,1024], index: 2, kind: input, shape index: {}]   ;;  %s4657_s3 = inlined_call_operand.vmem [shape: f32[2,416,32], index: 3, kind: input, shape index: {}]   ;;  %s4658_s4 = inlined_call_operand.vmem [shape: f32[16,128], index: 4, kind: input, shape index: {}]   ;;  %s4659_s5 = inlined_call_operand.hbm [shape: f32[2,8,128], index: 5, kind: output, shape index: {}]  }
   0x1   :  { %v21_v0 = vld [vmem:[%s4654_s0] sm:$0xff]  ;;  %v22_v2 = vld [vmem:[%s4654_s0 + $0x8] sm:$0xff] }
   0x2   :  { %v29_v1 = vld [vmem:[%s4658_s4] sm:$0xff] }
   0x3   :  { %v31_v3 = vadd.f32 %v29_v1, %v21_v0  ;;  %v32_v4 = vadd.f32 %v29_v1, %v22_v2 }
   0x4   :  { %10 = vsyncpa [#allocation3], 0  ;;  %v74_v17 = vld [vmem:[%s4656_s2 + $0x8] sm:$0xff]  ;;  %v76_v19 = vld [vmem:[%s4656_s2 + $0x18] sm:$0xff]  ;;  %v3742_v24 = vmov 0.0   ;;  %v61_v47 = vlaneseq  ;;  %vm3743_vm1 = vmmov 0  }
   0x5   :  { %v34_v5 = vsel %vm33_vm0, %v31_v3, 0.0  ;;  %v37_v6 = vsel %vm33_vm0, %v32_v4, 0.0  ;;  %v82_v18 = vld [vmem:[%s4656_s2 + $0x48] sm:$0xff]  ;;  %v84_v21 = vld [vmem:[%s4656_s2 + $0x58] sm:$0xff]  ;;  %v73_v22 = vld [vmem:[%s4656_s2] sm:$0xff]  ;;  %258 = vmatprep.mubr.f32.mxu0 %v3742_v24  ;;  %335 = vmatprep.mubr.f32.mxu1 %v3742_v24  ;;  %vm503_vm4 = vcmask 64512  }
   0x6   :  { %35 = vadd.xlane.f32.xlu0 %v34_v5  ;;  %v3431_v20 = vpack.c.bf16 %v82_v18, %v74_v17  ;;  %v81_v23 = vld [vmem:[%s4656_s2 + $0x40] sm:$0xff]  ;;  %v3439_v25 = vpack.c.bf16 %v84_v21, %v76_v19  ;;  %v75_v27 = vld [vmem:[%s4656_s2 + $0x10] sm:$0xff]  ;;  %v90_v29 = vld [vmem:[%s4656_s2 + $0x88] sm:$0xff]  ;;  %v3855_v51 = vshrl.u32 %v61_v47, 7 }
   0x7   :  { %v3433_v26 = vpack.c.bf16 %v81_v23, %v73_v22  ;;  %v83_v28 = vld [vmem:[%s4656_s2 + $0x50] sm:$0xff]  ;;  %v98_v31 = vld [vmem:[%s4656_s2 + $0xc8] sm:$0xff]  ;;  %v92_v32 = vld [vmem:[%s4656_s2 + $0x98] sm:$0xff] }
   0x8   :  { %3432 = vmatprep.subr.bf16.mxu0 %v3431_v20  ;;  %v3441_v30 = vpack.c.bf16 %v83_v28, %v75_v27  ;;  %v100_v33 = vld [vmem:[%s4656_s2 + $0xd8] sm:$0xff]  ;;  %3440 = vmatprep.subr.bf16.mxu1 %v3439_v25  ;;  %v3435_v34 = vpack.c.bf16 %v98_v31, %v90_v29  ;;  %v89_v36 = vld [vmem:[%s4656_s2 + $0x80] sm:$0xff]  ;;  %v91_v38 = vld [vmem:[%s4656_s2 + $0x90] sm:$0xff]  ;;  %v3858_v53 = vsub.s32 0, %v3855_v51  ;;  %v3864_v55 = vsub.s32 1, %v3855_v51 }
   0x9   :  { %3434 = vmatpush1.bf16.msra.mxu0 %v3433_v26  ;;  %v3443_v35 = vpack.c.bf16 %v100_v33, %v92_v32  ;;  %v97_v37 = vld [vmem:[%s4656_s2 + $0xc0] sm:$0xff]  ;;  %v99_v40 = vld [vmem:[%s4656_s2 + $0xd0] sm:$0xff]  ;;  %v78_v42 = vld [vmem:[%s4656_s2 + $0x28] sm:$0xff] }
   0xa   :  { %38 = vadd.xlane.f32.xlu0 %v37_v6  ;;  %3442 = vmatpush1.bf16.msra.mxu1 %v3441_v30  ;;  %v3437_v39 = vpack.c.bf16 %v97_v37, %v89_v36  ;;  %v3445_v41 = vpack.c.bf16 %v99_v40, %v91_v38  ;;  %v86_v43 = vld [vmem:[%s4656_s2 + $0x68] sm:$0xff]  ;;  %v77_v60 = vld [vmem:[%s4656_s2 + $0x20] sm:$0xff] }
   0xb   :  { %3436 = vmatprep.subr.bf16.mxu0 %v3435_v34  ;;  %3444 = vmatprep.subr.bf16.mxu1 %v3443_v35  ;;  %v3447_v44 = vpack.c.bf16 %v86_v43, %v78_v42  ;;  %v30_v54 = vld [vmem:[%s4658_s4 + $0x8] sm:$0xff]  ;;  %v85_v61 = vld [vmem:[%s4656_s2 + $0x60] sm:$0xff] }
   0xc   :  { %v64_v56 = vrot.slane %v30_v54, %v3858_v53  ;;  %v70_v59 = vrot.slane %v30_v54, %v3864_v55  ;;  %v94_v63 = vld [vmem:[%s4656_s2 + $0xa8] sm:$0xff]  ;;  %v3449_v2 = vpack.c.bf16 %v85_v61, %v77_v60  ;;  %v93_v5 = vld [vmem:[%s4656_s2 + $0xa0] sm:$0xff] }
   0xd   :  { %3438 = vmatpush1.bf16.msra.mxu0 %v3437_v39  ;;  %v102_v0 = vld [vmem:[%s4656_s2 + $0xe8] sm:$0xff]  ;;  %v101_v6 = vld [vmem:[%s4656_s2 + $0xe0] sm:$0xff] }
   0xe   :  { %3446 = vmatpush1.bf16.msra.mxu1 %v3445_v41  ;;  %3448 = vmatprep.subr.bf16.mxu0 %v3447_v44  ;;  %v109_v26 = vld [vmem:[%s4656_s2 + $0x120] sm:$0xff] }
   0xf   :  { %3639 = vmatprep.subr.bf16.mxu1 %v3447_v44  ;;  %v183_v34 = vrot.slane %v109_v26, %v3858_v53  ;;  %v23_v44 = vld [vmem:[%s4655_s1] sm:$0x1] }
  0x10   :  { %vm25_vm2 = vcmp.gt.f32.partialorder %v23_v44, 0.5 }
  0x93   :  { %v36_v7 = vpop.xlane.xlu0 %35 }
  0x94   :  { %v41_v8 = vmul.f32 0.03125, %v36_v7  ;;  %v3451_v7 = vpack.c.bf16 %v102_v0, %v94_v63 }
  0x96   :  { %v3789_v9 = vsub.f32 %v31_v3, %v41_v8 }
  0x97   :  { %v39_v10 = vpop.xlane.xlu0 %38 }
  0x98   :  { %v42_v11 = vmul.f32 0.03125, %v39_v10  ;;  %v45_v12 = vmul.f32 %v3789_v9, %v3789_v9 }
  0x9a   :  { %v3793_v13 = vsub.f32 %v32_v4, %v42_v11  ;;  %v47_v14 = vsel %vm33_vm0, %v45_v12, 0.0  ;;  %v107_v11 = vld [vmem:[%s4656_s2 + $0x110] sm:$0xff]  ;;  %v108_v12 = vld [vmem:[%s4656_s2 + $0x118] sm:$0xff] }
  0x9b   :  { %48 = vadd.xlane.f32.xlu1 %v47_v14  ;;  %v175_v14 = vrot.slane %v107_v11, %v3858_v53 }
  0x9c   :  { %v46_v15 = vmul.f32 %v3793_v13, %v3793_v13 }
  0x9e   :  { %v50_v16 = vsel %vm33_vm0, %v46_v15, 0.0  ;;  %v106_v15 = vld [vmem:[%s4656_s2 + $0x108] sm:$0xff] }
  0x9f   :  { %51 = vadd.xlane.f32.xlu1 %v50_v16  ;;  %v179_v16 = vrot.slane %v108_v12, %v3858_v53  ;;  %v171_v21 = vrot.slane %v106_v15, %v3858_v53 }
 0x128   :  { %v49_v45 = vpop.xlane.xlu1 %48 }
 0x129   :  { %v53_v46 = vmul.f32 0.03125, %v49_v45  ;;  %v24_v45 = vld [vmem:[%s4655_s1 + $0x1] sm:$0x1] }
 0x12a   :  { %vm26_vm3 = vcmp.gt.f32.partialorder %v24_v45, 0.5 }
 0x12b   :  { %v55_v48 = vadd.f32 1e-05, %v53_v46  ;;  %v3744_v46 = vmov -1e+09  }
 0x12c   :  { %v52_v49 = vpop.xlane.xlu1 %51  ;;  %v27_v47 = vsel %vm25_vm2, 0.0, %v3744_v46 }
 0x12d   :  { %3649 = vrsqrt.f32 %v55_v48  ;;  %v54_v50 = vmul.f32 0.03125, %v52_v49  ;;  %v3960_v48 = vrot.slane %v27_v47, %v3858_v53  ;;  %v115_v47 = vld [vmem:[%s4657_s3 + $0x18] sm:$0xff] }
 0x12f   :  { %v56_v52 = vadd.f32 1e-05, %v54_v50 }
 0x131   :  { %3651 = vrsqrt.f32 %v56_v52 }
 0x137   :  { %v3650_v57 = vpop.eup %3649 }
 0x138   :  { %v59_v58 = vmul.f32 %v3650_v57, %v3789_v9  ;;  %v3453_v9 = vpack.c.bf16 %v101_v6, %v93_v5 }
 0x13a   :  { %v65_v62 = vmul.f32 %v64_v56, %v59_v58 }
 0x13b   :  { %v3652_v1 = vpop.eup %3651 }
 0x13c   :  { %v3881_v3 = vadd.f32 %v70_v59, %v65_v62  ;;  %v60_v4 = vmul.f32 %v3652_v1, %v3793_v13  ;;  %v3923_v13 = vld [vmem:[%s4656_s2 + $0x100] sm:$0xff] }
 0x13d   :  { %v167_v17 = vrot.slane %v3923_v13, %v3858_v53 }
 0x13e   :  { %2958 = vmatmul.mubr.msk.f32.vlgmr.msra.gmra.mrb[0].mxu0 %vm33_vm0, %v3881_v3  ;;  %2960 = vmatmul.mubr.msk.f32.vlgmr.msra.gmra.mrb[0].mxu1 %vm33_vm0, %v3881_v3  ;;  %v66_v8 = vmul.f32 %v64_v56, %v60_v4  ;;  %v28_v56 = vsel %vm26_vm3, 0.0, %v3744_v46  ;;  %v114_v46 = vld [vmem:[%s4657_s3 + $0x10] sm:$0xff] }
 0x13f   :  { %3450 = vmatpush1.bf16.msra.mxu0 %v3449_v2  ;;  %3641 = vmatpush1.bf16.msra.mxu1 %v3449_v2  ;;  %v3965_v61 = vrot.slane %v28_v56, %v3858_v53  ;;  %v116_v56 = vld [vmem:[%s4657_s3 + $0x20] sm:$0xff] }
 0x140   :  { %264 = vmatprep.mubr.f32.mxu0 %v3742_v24  ;;  %341 = vmatprep.mubr.f32.mxu1 %v3742_v24  ;;  %v3896_v10 = vadd.f32 %v70_v59, %v66_v8 }
 0x141   :  { %3452 = vmatprep.subr.bf16.mxu0 %v3451_v7  ;;  %3640 = vmatprep.subr.bf16.mxu1 %v3451_v7 }
 0x142   :  { %2959 = vmatmul.mubr.msk.f32.gmra.mrb[2].mxu0 %vm33_vm0, %v3896_v10  ;;  %2961 = vmatmul.mubr.msk.f32.gmra.mrb[2].mxu1 %vm33_vm0, %v3896_v10 }
 0x143   :  { %3454 = vmatpush1.bf16.msra.mxu0 %v3453_v9  ;;  %3642 = vmatpush1.bf16.msra.mxu1 %v3453_v9 }
 0x144   :  { %412 = vmatprep.mubr.f32.mxu0 %v3742_v24  ;;  %418 = vmatprep.mubr.f32.mxu1 %v3742_v24 }
 0x145   :  { %3237 = vmatprep.subr.mxu1 %v3742_v24  ;;  %3247 = vmatprep.subr.mxu0 %v3742_v24 }
 0x146   :  { %2962 = vmatmul.mubr.msk.f32.vlgmr.msra.gmra.mrb[4].mxu0 %vm33_vm0, %v3881_v3  ;;  %2963 = vmatmul.mubr.msk.f32.vlgmr.msra.gmra.mrb[4].mxu1 %vm33_vm0, %v3896_v10 }
 0x147   :  { %3239 = vmatprep.mubr.msk.f32.mxu1 %vm3743_vm1, %v3742_v24  ;;  %3249 = vmatprep.mubr.msk.f32.mxu0 %vm3743_vm1, %v3742_v24 }
 0x211   :  { %v260_v18 = vpop.f32.mrb[0].mxu0  ;;  %v337_v19 = vpop.f32.mrb[0].mxu1 }
 0x212   :  { %v338_v20 = vadd.f32 %v337_v19, %v175_v14  ;;  %v262_v22 = vpop.f32.mrb[1].mxu0  ;;  %v339_v23 = vpop.f32.mrb[1].mxu1  ;;  %v261_v27 = vadd.f32 %v260_v18, %v167_v17 }
 0x213   :  { %v340_v25 = vadd.f32 %v339_v23, %v179_v16  ;;  %v263_v30 = vadd.f32 %v262_v22, %v171_v21 }
 0x214   :  { %3238 = vmatpush3.xpose.msra.mxu1 %v338_v20 }
 0x215   :  { %v266_v28 = vpop.f32.mrb[2].mxu0  ;;  %v343_v29 = vpop.f32.mrb[2].mxu1  ;;  %3248 = vmatpush3.xpose.msra.mxu0 %v340_v25  ;;  %3242 = vmatprep.subr.mxu1 %v3742_v24 }
 0x216   :  { %v344_v31 = vadd.f32 %v343_v29, %v175_v14  ;;  %v268_v32 = vpop.f32.mrb[3].mxu0  ;;  %v345_v33 = vpop.f32.mrb[3].mxu1  ;;  %3257 = vmatprep.subr.mxu0 %v3742_v24  ;;  %v267_v37 = vadd.f32 %v266_v28, %v167_v17 }
 0x217   :  { %3240 = vmatmul.mubr.f32.vlgmr.msra.gmra.mrb[6].mxu1 %v261_v27  ;;  %v346_v42 = vadd.f32 %v345_v33, %v179_v16  ;;  %v269_v43 = vadd.f32 %v268_v32, %v171_v21 }
 0x218   :  { %3250 = vmatmul.mubr.f32.vlgmr.msra.gmra.mrb[6].mxu0 %v263_v30  ;;  %3244 = vmatprep.mubr.msk.f32.mxu1 %vm3743_vm1, %v3742_v24 }
 0x219   :  { %v414_v35 = vpop.f32.mrb[4].mxu0  ;;  %v420_v36 = vpop.f32.mrb[4].mxu1  ;;  %3258 = vmatpush3.xpose.msra.mxu0 %v344_v31  ;;  %3259 = vmatprep.mubr.msk.f32.mxu0 %vm3743_vm1, %v3742_v24 }
 0x21a   :  { %v415_v38 = vadd.f32 %v414_v35, %v183_v34  ;;  %v3943_v39 = vadd.f32 %v420_v36, %v183_v34  ;;  %v3945_v40 = vpop.f32.mrb[5].mxu0  ;;  %v3947_v41 = vpop.f32.mrb[5].mxu1  ;;  %3267 = vmatprep.subr.mxu0 %v3742_v24  ;;  %v128_v34 = vld [vmem:[%s4657_s3 + $0x80] sm:$0xff]  ;;  %v129_v35 = vld [vmem:[%s4657_s3 + $0x88] sm:$0xff] }
 0x21b   :  { %v112_v36 = vld [vmem:[%s4657_s3] sm:$0xff] }
 0x21c   :  { %3243 = vmatpush3.msra.mxu1 %v415_v38  ;;  %3260 = vmatmul.mubr.f32.vlgmr.msra.gmra.mrb[8].mxu0 %v267_v37  ;;  %v3455_v37 = vpack.c.bf16 %v129_v35, %v128_v34  ;;  %v113_v38 = vld [vmem:[%s4657_s3 + $0x8] sm:$0xff] }
 0x21d   :  { %3268 = vmatpush3.xpose.msra.mxu0 %v346_v42  ;;  %3269 = vmatprep.mubr.msk.f32.mxu0 %vm3743_vm1, %v3742_v24  ;;  %v130_v42 = vld [vmem:[%s4657_s3 + $0x90] sm:$0xff]  ;;  %v3457_v44 = vpack.c.bf16 %v113_v38, %v112_v36 }
 0x21e   :  { %3252 = vmatprep.subr.mxu1 %v3742_v24  ;;  %3456 = vmatprep.subr.bf16.mxu0 %v3455_v37 }
 0x220   :  { %3270 = vmatmul.mubr.f32.vlgmr.msra.gmra.mrb[10].mxu0 %v269_v43  ;;  %v131_v43 = vld [vmem:[%s4657_s3 + $0x98] sm:$0xff] }
 0x221   :  { %v3459_v45 = vpack.c.bf16 %v131_v43, %v130_v42  ;;  %3458 = vmatpush3.bf16.msra.mxu0 %v3457_v44 }
 0x223   :  { %3460 = vmatprep.subr.bf16.mxu0 %v3459_v45  ;;  %v127_v45 = vld [vmem:[%s4657_s3 + $0x78] sm:$0xff] }
 0x2ea   :  { %v491_v49 = vpop.f32.mrb[6].mxu1 }
 0x2eb   :  { %v495_v50 = vmul.f32 0.25, %v491_v49  ;;  %v3241_v52 = vpop.f32.mrb[7].mxu1  ;;  %v654_v54 = vpop.f32.mrb[6].mxu0  ;;  %v132_v49 = vld [vmem:[%s4657_s3 + $0xa0] sm:$0xff] }
 0x2ec   :  { %v658_v57 = vmul.f32 0.25, %v654_v54  ;;  %v3251_v58 = vpop.f32.mrb[7].mxu0  ;;  %v3461_v52 = vpack.c.bf16 %v115_v47, %v114_v46 }
 0x2ed   :  { %v502_v59 = vadd.f32 %v3960_v48, %v495_v50  ;;  %v133_v50 = vld [vmem:[%s4657_s3 + $0xa8] sm:$0xff]  ;;  %v134_v58 = vld [vmem:[%s4657_s3 + $0xb0] sm:$0xff] }
 0x2ee   :  { %v659_v60 = vadd.f32 %v658_v57, %v3960_v48  ;;  %v3463_v54 = vpack.c.bf16 %v133_v50, %v132_v49  ;;  %v117_v57 = vld [vmem:[%s4657_s3 + $0x28] sm:$0xff]  ;;  %3462 = vmatpush3.bf16.msra.mxu0 %v3461_v52 }
 0x2ef   :  { %v810_v62 = vpop.f32.mrb[8].mxu0  ;;  %v504_v63 = vsel %vm503_vm4, %v502_v59, -inf }
 0x2f0   :  { %v814_v0 = vmul.f32 0.25, %v810_v62  ;;  %505 = vmax.xlane.f32.xlu0 %v504_v63  ;;  %v3261_v1 = vpop.f32.mrb[9].mxu0  ;;  %v660_v2 = vsel %vm503_vm4, %v659_v60, -inf  ;;  %3464 = vmatprep.subr.bf16.mxu0 %v3463_v54  ;;  %v118_v63 = vld [vmem:[%s4657_s3 + $0x30] sm:$0xff] }
 0x2f1   :  { %661 = vmax.xlane.f32.xlu1 %v660_v2  ;;  %v136_v1 = vld [vmem:[%s4657_s3 + $0xc0] sm:$0xff]  ;;  %v137_v2 = vld [vmem:[%s4657_s3 + $0xc8] sm:$0xff] }
 0x2f2   :  { %v821_v4 = vadd.f32 %v3965_v61, %v814_v0  ;;  %v119_v0 = vld [vmem:[%s4657_s3 + $0x38] sm:$0xff] }
 0x2f3   :  { %v972_v5 = vpop.f32.mrb[10].mxu0 }
 0x2f4   :  { %v976_v6 = vmul.f32 0.25, %v972_v5  ;;  %v3271_v7 = vpop.f32.mrb[11].mxu0  ;;  %v822_v8 = vsel %vm503_vm4, %v821_v4, -inf  ;;  %v3471_v5 = vpack.c.bf16 %v137_v2, %v136_v1 }
 0x2f5   :  { %823 = vmax.xlane.f32.xlu0 %v822_v8  ;;  %v121_v7 = vld [vmem:[%s4657_s3 + $0x48] sm:$0xff]  ;;  %v138_v8 = vld [vmem:[%s4657_s3 + $0xd0] sm:$0xff] }
 0x2f6   :  { %v977_v9 = vadd.f32 %v976_v6, %v3965_v61  ;;  %v120_v6 = vld [vmem:[%s4657_s3 + $0x40] sm:$0xff] }
 0x2f8   :  { %v978_v11 = vsel %vm503_vm4, %v977_v9, -inf }
 0x2f9   :  { %979 = vmax.xlane.f32.xlu1 %v978_v11  ;;  %v3473_v11 = vpack.c.bf16 %v121_v7, %v120_v6 }
 0x37d   :  { %v506_v12 = vpop.xlane.xlu0 %505 }
 0x37e   :  { %v507_v14 = vsub.f32 %v502_v59, %v506_v12  ;;  %v662_v15 = vpop.xlane.xlu1 %661  ;;  %v135_v59 = vld [vmem:[%s4657_s3 + $0xb8] sm:$0xff] }
 0x37f   :  { %v663_v16 = vsub.f32 %v659_v60, %v662_v15  ;;  %v3465_v60 = vpack.c.bf16 %v117_v57, %v116_v56  ;;  %v3467_v62 = vpack.c.bf16 %v135_v59, %v134_v58  ;;  %v123_v15 = vld [vmem:[%s4657_s3 + $0x58] sm:$0xff]  ;;  %v1065_v59 = vrot.slane %v3923_v13, %v3864_v55 }
 0x380   :  { %v508_v17 = vmul.f32 1.442695, %v507_v14  ;;  %v122_v14 = vld [vmem:[%s4657_s3 + $0x50] sm:$0xff] }
 0x381   :  { %v664_v18 = vmul.f32 1.442695, %v663_v16  ;;  %3466 = vmatpush3.bf16.msra.mxu0 %v3465_v60  ;;  %v140_v16 = vld [vmem:[%s4657_s3 + $0xe0] sm:$0xff] }
 0x382   :  { %3653 = vpow2.f32 %v508_v17  ;;  %v824_v19 = vpop.xlane.xlu0 %823  ;;  %3468 = vmatprep.subr.bf16.mxu0 %v3467_v62  ;;  %v141_v17 = vld [vmem:[%s4657_s3 + $0xe8] sm:$0xff] }
 0x383   :  { %3655 = vpow2.f32 %v664_v18  ;;  %v825_v20 = vsub.f32 %v821_v4, %v824_v19  ;;  %v3469_v4 = vpack.c.bf16 %v119_v0, %v118_v63  ;;  %v3477_v18 = vpack.c.bf16 %v123_v15, %v122_v14 }
 0x384   :  { %v3479_v19 = vpack.c.bf16 %v141_v17, %v140_v16 }
 0x385   :  { %v826_v21 = vmul.f32 1.442695, %v825_v20  ;;  %3470 = vmatpush3.bf16.msra.mxu0 %v3469_v4  ;;  %v124_v20 = vld [vmem:[%s4657_s3 + $0x60] sm:$0xff] }
 0x386   :  { %v980_v22 = vpop.xlane.xlu1 %979  ;;  %3472 = vmatprep.subr.bf16.mxu0 %v3471_v5 }
 0x387   :  { %3657 = vpow2.f32 %v826_v21  ;;  %v981_v23 = vsub.f32 %v977_v9, %v980_v22  ;;  %v139_v9 = vld [vmem:[%s4657_s3 + $0xd8] sm:$0xff]  ;;  %v125_v21 = vld [vmem:[%s4657_s3 + $0x68] sm:$0xff] }
 0x388   :  { %v3475_v12 = vpack.c.bf16 %v139_v9, %v138_v8  ;;  %v3481_v22 = vpack.c.bf16 %v125_v21, %v124_v20  ;;  %v87_v20 = vld [vmem:[%s4656_s2 + $0x70] sm:$0xff] }
 0x389   :  { %v982_v25 = vmul.f32 1.442695, %v981_v23  ;;  %3474 = vmatpush3.bf16.msra.mxu0 %v3473_v11 }
 0x38a   :  { %3476 = vmatprep.subr.bf16.mxu0 %v3475_v12 }
 0x38b   :  { %3659 = vpow2.f32 %v982_v25 }
 0x38c   :  { %v3973_v26 = vpop.eup %3653 }
 0x38d   :  { %v3975_v27 = vpop.eup %3655  ;;  %v510_v28 = vsel %vm503_vm4, %v3973_v26, 0.0  ;;  %3478 = vmatpush3.bf16.msra.mxu0 %v3477_v18 }
 0x38e   :  { %511 = vadd.xlane.f32.xlu0 %v510_v28  ;;  %v666_v29 = vsel %vm503_vm4, %v3975_v27, 0.0  ;;  %3480 = vmatprep.subr.bf16.mxu0 %v3479_v19 }
 0x38f   :  { %667 = vadd.xlane.f32.xlu1 %v666_v29  ;;  %v110_v29 = vld [vmem:[%s4656_s2 + $0x128] sm:$0xff] }
 0x391   :  { %v3981_v30 = vpop.eup %3657  ;;  %3482 = vmatpush3.bf16.msra.mxu0 %v3481_v22  ;;  %v95_v22 = vld [vmem:[%s4656_s2 + $0xb0] sm:$0xff] }
 0x392   :  { %v828_v31 = vsel %vm503_vm4, %v3981_v30, 0.0 }
 0x393   :  { %829 = vadd.xlane.f32.xlu0 %v828_v31  ;;  %v187_v31 = vrot.slane %v110_v29, %v3858_v53 }
 0x395   :  { %v3985_v32 = vpop.eup %3659  ;;  %v417_v37 = vadd.f32 %v3945_v40, %v187_v31  ;;  %v423_v43 = vadd.f32 %v3947_v41, %v187_v31  ;;  %v126_v41 = vld [vmem:[%s4657_s3 + $0x70] sm:$0xff] }
 0x396   :  { %v984_v33 = vsel %vm503_vm4, %v3985_v32, 0.0 }
 0x397   :  { %985 = vadd.xlane.f32.xlu1 %v984_v33 }
 0x41b   :  { %v512_v23 = vpop.xlane.xlu0 %511 }
 0x41c   :  { %3661 = vrcp.f32 %v512_v23  ;;  %v668_v25 = vpop.xlane.xlu1 %667  ;;  %v103_v23 = vld [vmem:[%s4656_s2 + $0xf0] sm:$0xff] }
 0x41d   :  { %3663 = vrcp.f32 %v668_v25  ;;  %v3491_v25 = vpack.c.bf16 %v103_v23, %v95_v22 }
 0x420   :  { %v830_v28 = vpop.xlane.xlu0 %829 }
 0x421   :  { %3665 = vrcp.f32 %v830_v28 }
 0x424   :  { %v986_v33 = vpop.xlane.xlu1 %985 }
 0x425   :  { %3667 = vrcp.f32 %v986_v33 }
 0x426   :  { %v3662_v34 = vpop.eup %3661 }
 0x427   :  { %v514_v35 = vmul.f32 %v3662_v34, %v3973_v26  ;;  %v3664_v36 = vpop.eup %3663 }
 0x428   :  { %v670_v38 = vmul.f32 %v3664_v36, %v3975_v27 }
 0x429   :  { %3245 = vmatmul.mubr.msk.f32.vlgmr.msra.gmra.mrb[8].mxu1 %vm503_vm4, %v514_v35  ;;  %v4130_v35 = vsub.s32 2, %v3855_v51 }
 0x42a   :  { %3253 = vmatpush3.msra.mxu1 %v417_v37  ;;  %3254 = vmatprep.mubr.msk.f32.mxu1 %vm3743_vm1, %v3742_v24  ;;  %v4133_v37 = vsub.s32 3, %v3855_v51 }
 0x42b   :  { %3262 = vmatprep.subr.mxu1 %v3742_v24  ;;  %v3666_v42 = vpop.eup %3665 }
 0x42c   :  { %v832_v40 = vmul.f32 %v3666_v42, %v3981_v30  ;;  %v143_v30 = vld [vmem:[%s4657_s3 + $0xf8] sm:$0xff] }
 0x42d   :  { %3255 = vmatmul.mubr.msk.f32.vlgmr.msra.gmra.mrb[10].mxu1 %vm503_vm4, %v670_v38  ;;  %v1172_v38 = vrot.slane %v3923_v13, %v4130_v35 }
 0x42e   :  { %3263 = vmatpush3.msra.mxu1 %v3943_v39  ;;  %3264 = vmatprep.mubr.msk.f32.mxu1 %vm3743_vm1, %v3742_v24  ;;  %v142_v39 = vld [vmem:[%s4657_s3 + $0xf0] sm:$0xff] }
 0x42f   :  { %3272 = vmatprep.subr.mxu1 %v3742_v24  ;;  %v3668_v26 = vpop.eup %3667  ;;  %v3483_v44 = vpack.c.bf16 %v143_v30, %v142_v39 }
 0x430   :  { %v988_v27 = vmul.f32 %v3668_v26, %v3985_v32  ;;  %v3485_v32 = vpack.c.bf16 %v127_v45, %v126_v41  ;;  %v1178_v26 = vrot.slane %v3923_v13, %v4133_v37  ;;  %v144_v45 = vld [vmem:[%s4657_s3 + $0x100] sm:$0xff] }
 0x431   :  { %3265 = vmatmul.mubr.msk.f32.vlgmr.msra.gmra.mrb[12].mxu1 %vm503_vm4, %v832_v40  ;;  %3484 = vmatprep.subr.bf16.mxu0 %v3483_v44 }
 0x432   :  { %3273 = vmatpush3.msra.mxu1 %v423_v43  ;;  %3274 = vmatprep.mubr.msk.f32.mxu1 %vm3743_vm1, %v3742_v24 }
 0x433   :  { %3486 = vmatpush3.bf16.msra.mxu0 %v3485_v32  ;;  %v145_v32 = vld [vmem:[%s4657_s3 + $0x108] sm:$0xff] }
 0x435   :  { %3275 = vmatmul.mubr.msk.f32.vlgmr.msra.gmra.mrb[14].mxu1 %vm503_vm4, %v988_v27 }
 0x4fc   :  { %v584_v46 = vpop.f32.mrb[8].mxu1 }
 0x4fd   :  { %v3246_v47 = vpop.f32.mrb[9].mxu1 }
 0x4fe   :  { %v146_v47 = vld [vmem:[%s4657_s3 + $0x110] sm:$0xff] }
 0x500   :  { %v740_v49 = vpop.f32.mrb[10].mxu1 }
 0x501   :  { %v3256_v50 = vpop.f32.mrb[11].mxu1  ;;  %1130 = vmatprep.mubr.f32.mxu0 %v740_v49  ;;  %v147_v49 = vld [vmem:[%s4657_s3 + $0x118] sm:$0xff] }
 0x502   :  { %1131 = vmatmul.mubr.f32.vlgmr.msra.gmra.mrb[12].mxu0 %v584_v46  ;;  %v3495_v46 = vpack.c.bf16 %v145_v32, %v144_v45  ;;  %v3499_v50 = vpack.c.bf16 %v147_v49, %v146_v47 }
 0x504   :  { %v902_v52 = vpop.f32.mrb[12].mxu1 }
 0x505   :  { %v3266_v54 = vpop.f32.mrb[13].mxu1 }
 0x506   :  { %v149_v54 = vld [vmem:[%s4657_s3 + $0x128] sm:$0xff] }
 0x508   :  { %v1058_v56 = vpop.f32.mrb[14].mxu1 }
 0x509   :  { %v3276_v57 = vpop.f32.mrb[15].mxu1  ;;  %1135 = vmatprep.mubr.f32.mxu0 %v1058_v56 }
 0x50a   :  { %1136 = vmatmul.mubr.f32.gmra.mrb[14].mxu0 %v902_v52  ;;  %v148_v52 = vld [vmem:[%s4657_s3 + $0x120] sm:$0xff]  ;;  %v150_v57 = vld [vmem:[%s4657_s3 + $0x130] sm:$0xff] }
 0x50b   :  { %1582 = vmatprep.mubr.f32.mxu0 %v3742_v24  ;;  %v3503_v56 = vpack.c.bf16 %v149_v54, %v148_v52 }
 0x5d5   :  { %v3117_v58 = vpop.f32.mrb[12].mxu0 }
 0x5d6   :  { %v3118_v60 = vpop.f32.mrb[13].mxu0 }
 0x5d7   :  { %v3119_v62 = vadd.f32 %v3118_v60, %v3117_v58  ;;  %v151_v58 = vld [vmem:[%s4657_s3 + $0x138] sm:$0xff]  ;;  %v152_v60 = vld [vmem:[%s4657_s3 + $0x140] sm:$0xff] }
 0x5d9   :  { %v1133_v63 = vadd.f32 %v3119_v62, %v1065_v59  ;;  %v153_v62 = vld [vmem:[%s4657_s3 + $0x148] sm:$0xff] }
 0x5db   :  { %v1141_v0 = vadd.f32 %v1133_v63, %v3881_v3  ;;  %v154_v63 = vld [vmem:[%s4657_s3 + $0x150] sm:$0xff] }
 0x5dd   :  { %v3120_v1 = vpop.f32.mrb[14].mxu0  ;;  %v1143_v2 = vsel %vm33_vm0, %v1141_v0, 0.0 }
 0x5de   :  { %v3121_v4 = vpop.f32.mrb[15].mxu0  ;;  %1144 = vadd.xlane.f32.xlu0 %v1143_v2 }
 0x5df   :  { %v3122_v5 = vadd.f32 %v3121_v4, %v3120_v1  ;;  %v155_v1 = vld [vmem:[%s4657_s3 + $0x158] sm:$0xff]  ;;  %v156_v4 = vld [vmem:[%s4657_s3 + $0x160] sm:$0xff] }
 0x5e0   :  { %v3515_v2 = vpack.c.bf16 %v155_v1, %v154_v63  ;;  %v2978_v63 = vld [vmem:[%s4656_s2 + $0x188] sm:$0xff] }
 0x5e1   :  { %v1138_v6 = vadd.f32 %v3122_v5, %v1065_v59  ;;  %v3507_v59 = vpack.c.bf16 %v151_v58, %v150_v57  ;;  %v157_v5 = vld [vmem:[%s4657_s3 + $0x168] sm:$0xff] }
 0x5e3   :  { %v1142_v7 = vadd.f32 %v1138_v6, %v3896_v10  ;;  %v79_v10 = vld [vmem:[%s4656_s2 + $0x30] sm:$0xff]  ;;  %v3519_v6 = vpack.c.bf16 %v157_v5, %v156_v4  ;;  %v2970_v4 = vld [vmem:[%s4656_s2 + $0x140] sm:$0xff] }
 0x5e4   :  { %v3487_v21 = vpack.c.bf16 %v87_v20, %v79_v10  ;;  %v2977_v5 = vld [vmem:[%s4656_s2 + $0x180] sm:$0xff] }
 0x5e5   :  { %v1146_v8 = vsel %vm33_vm0, %v1142_v7, 0.0 }
 0x5e6   :  { %1147 = vadd.xlane.f32.xlu1 %v1146_v8  ;;  %3488 = vmatprep.subr.bf16.mxu1 %v3487_v21  ;;  %v159_v8 = vld [vmem:[%s4657_s3 + $0x178] sm:$0xff] }
 0x5e7   :  { %3490 = vmatpush3.bf16.msra.mxu1 %v3487_v21 }
 0x5e8   :  { %3492 = vmatprep.subr.bf16.mxu1 %v3491_v25 }
 0x5eb   :  { %3494 = vmatpush3.bf16.msra.mxu1 %v3491_v25 }
 0x5ec   :  { %3496 = vmatprep.subr.bf16.mxu1 %v3495_v46 }
 0x66b   :  { %v1145_v9 = vpop.xlane.xlu0 %1144 }
 0x66c   :  { %v1149_v11 = vmul.f32 0.03125, %v1145_v9 }
 0x66e   :  { %v1151_v12 = vsub.f32 %v1141_v0, %v1149_v11  ;;  %v3511_v0 = vpack.c.bf16 %v153_v62, %v152_v60  ;;  %v111_v11 = vld [vmem:[%s4656_s2 + $0x130] sm:$0xff] }
 0x670   :  { %v1153_v14 = vmul.f32 %v1151_v12, %v1151_v12 }
 0x672   :  { %v1155_v15 = vsel %vm33_vm0, %v1153_v14, 0.0 }
 0x673   :  { %v1148_v16 = vpop.xlane.xlu1 %1147  ;;  %1156 = vadd.xlane.f32.xlu0 %v1155_v15 }
 0x674   :  { %v1150_v3 = vmul.f32 0.03125, %v1148_v16 }
 0x676   :  { %v1152_v17 = vsub.f32 %v1142_v7, %v1150_v3  ;;  %v158_v7 = vld [vmem:[%s4657_s3 + $0x170] sm:$0xff] }
 0x677   :  { %v3523_v9 = vpack.c.bf16 %v159_v8, %v158_v7  ;;  %v3529_v7 = vpack.c.bf16 %v2977_v5, %v2970_v4  ;;  %v2974_v8 = vld [vmem:[%s4656_s2 + $0x160] sm:$0xff]  ;;  %v3000_v5 = vld [vmem:[%s4656_s2 + $0x250] sm:$0xff] }
 0x678   :  { %v1154_v18 = vmul.f32 %v1152_v17, %v1152_v17 }
 0x67a   :  { %v1158_v19 = vsel %vm33_vm0, %v1154_v18, 0.0 }
 0x67b   :  { %1159 = vadd.xlane.f32.xlu1 %v1158_v19 }
 0x700   :  { %v1157_v28 = vpop.xlane.xlu0 %1156 }
 0x701   :  { %v1161_v29 = vmul.f32 0.03125, %v1157_v28 }
 0x703   :  { %v1163_v31 = vadd.f32 1e-05, %v1161_v29 }
 0x705   :  { %3669 = vrsqrt.f32 %v1163_v31 }
 0x708   :  { %v1160_v33 = vpop.xlane.xlu1 %1159 }
 0x709   :  { %v1162_v34 = vmul.f32 0.03125, %v1160_v33 }
 0x70b   :  { %v1164_v36 = vadd.f32 1e-05, %v1162_v34 }
 0x70d   :  { %3671 = vrsqrt.f32 %v1164_v36 }
 0x70f   :  { %v3670_v42 = vpop.eup %3669 }
 0x710   :  { %v1167_v40 = vmul.f32 %v3670_v42, %v1151_v12  ;;  %v1184_v12 = vrot.slane %v111_v11, %v3858_v53 }
 0x712   :  { %v1173_v43 = vmul.f32 %v1172_v38, %v1167_v40 }
 0x714   :  { %v4139_v27 = vadd.f32 %v1178_v26, %v1173_v43 }
 0x716   :  { %3285 = vmatprep.mubr.msk.f32.mxu1 %vm33_vm0, %v4139_v27 }
 0x717   :  { %v3672_v39 = vpop.eup %3671 }
 0x718   :  { %v1168_v30 = vmul.f32 %v3672_v39, %v1152_v17 }
 0x71a   :  { %v1174_v44 = vmul.f32 %v1172_v38, %v1168_v30 }
 0x71c   :  { %v4143_v41 = vadd.f32 %v1178_v26, %v1174_v44  ;;  %v4201_v26 = vsub.s32 4, %v3855_v51 }
 0x71e   :  { %3286 = vmatmul.mubr.msk.f32.vlgmr.msra.gmra.mrb[16].mxu1 %vm33_vm0, %v4143_v41  ;;  %v1287_v43 = vrot.slane %v3923_v13, %v4201_v26 }
 0x71f   :  { %3498 = vmatpush3.bf16.msra.mxu1 %v3495_v46 }
 0x720   :  { %3500 = vmatprep.subr.bf16.mxu1 %v3499_v50 }
 0x723   :  { %3502 = vmatpush3.bf16.msra.mxu1 %v3499_v50 }
 0x724   :  { %3504 = vmatprep.subr.bf16.mxu1 %v3503_v56 }
 0x727   :  { %3506 = vmatpush3.bf16.msra.mxu1 %v3503_v56 }
 0x728   :  { %3508 = vmatprep.subr.bf16.mxu1 %v3507_v59 }
 0x72b   :  { %3510 = vmatpush3.bf16.msra.mxu1 %v3507_v59 }
 0x72c   :  { %3512 = vmatprep.subr.bf16.mxu1 %v3511_v0 }
 0x72f   :  { %3514 = vmatpush3.bf16.msra.mxu1 %v3511_v0  ;;  %v2975_v0 = vld [vmem:[%s4656_s2 + $0x168] sm:$0xff] }
 0x730   :  { %3516 = vmatprep.subr.bf16.mxu1 %v3515_v2 }
 0x733   :  { %3518 = vmatpush3.bf16.msra.mxu1 %v3515_v2  ;;  %v2982_v2 = vld [vmem:[%s4656_s2 + $0x1a8] sm:$0xff] }
 0x734   :  { %3520 = vmatprep.subr.bf16.mxu1 %v3519_v6 }
 0x737   :  { %3522 = vmatpush3.bf16.msra.mxu1 %v3519_v6  ;;  %v3543_v6 = vpack.c.bf16 %v2982_v2, %v2975_v0 }
 0x738   :  { %3524 = vmatprep.subr.bf16.mxu1 %v3523_v9 }
 0x73b   :  { %3526 = vmatpush3.bf16.msra.mxu1 %v3523_v9  ;;  %v2981_v9 = vld [vmem:[%s4656_s2 + $0x1a0] sm:$0xff] }
 0x73c   :  { %v3545_v11 = vpack.c.bf16 %v2981_v9, %v2974_v8  ;;  %3544 = vmatprep.subr.bf16.mxu1 %v3543_v6  ;;  %v4331_v8 = vld [vmem:[%s4656_s2 + $0x240] sm:$0xff] }
 0x7f1   :  { %v3287_v14 = vpop.f32.mrb[16].mxu1 }
 0x7f2   :  { %v1263_v15 = vadd.f32 %v3287_v14, %v1184_v12  ;;  %v1257_v16 = vpop.f32.mrb[17].mxu1  ;;  %v2992_v14 = vld [vmem:[%s4656_s2 + $0x208] sm:$0xff] }
 0x7f3   :  { %v1258_v3 = vadd.f32 %v1257_v16, %v1184_v12  ;;  %v2985_v12 = vld [vmem:[%s4656_s2 + $0x1c8] sm:$0xff] }
 0x7f4   :  { %v1267_v17 = vmul.f32 %v1263_v15, %v1263_v15  ;;  %v3531_v16 = vpack.c.bf16 %v2992_v14, %v2985_v12  ;;  %v1499_v14 = vrot.slane %v3000_v5, %v3858_v53 }
 0x7f5   :  { %v1266_v18 = vmul.f32 %v1258_v3, %v1258_v3 }
 0x7f6   :  { %v1269_v19 = vmul.f32 %v1267_v17, %v1263_v15  ;;  %v2984_v17 = vld [vmem:[%s4656_s2 + $0x1c0] sm:$0xff] }
 0x7f7   :  { %v1268_v10 = vmul.f32 %v1266_v18, %v1258_v3  ;;  %v2991_v18 = vld [vmem:[%s4656_s2 + $0x200] sm:$0xff] }
 0x7f8   :  { %v1271_v20 = vmul.f32 0.044715, %v1269_v19 }
 0x7f9   :  { %v1270_v21 = vmul.f32 0.044715, %v1268_v10  ;;  %v3533_v10 = vpack.c.bf16 %v2991_v18, %v2984_v17  ;;  %v2999_v17 = vld [vmem:[%s4656_s2 + $0x248] sm:$0xff] }
 0x7fa   :  { %v1273_v22 = vadd.f32 %v1271_v20, %v1263_v15  ;;  %v2988_v20 = vld [vmem:[%s4656_s2 + $0x1e0] sm:$0xff] }
 0x7fb   :  { %v1272_v23 = vadd.f32 %v1270_v21, %v1258_v3  ;;  %v2995_v21 = vld [vmem:[%s4656_s2 + $0x220] sm:$0xff] }
 0x7fc   :  { %v1275_v25 = vmul.f32 0.7978846, %v1273_v22  ;;  %v3549_v22 = vpack.c.bf16 %v2995_v21, %v2988_v20  ;;  %v1495_v21 = vrot.slane %v2999_v17, %v3858_v53 }
 0x7fd   :  { %v1274_v28 = vmul.f32 0.7978846, %v1272_v23  ;;  %v2973_v23 = vld [vmem:[%s4656_s2 + $0x158] sm:$0xff] }
 0x7fe   :  { %3673 = vtanh.f32 %v1275_v25  ;;  %v2980_v25 = vld [vmem:[%s4656_s2 + $0x198] sm:$0xff] }
 0x7ff   :  { %3675 = vtanh.f32 %v1274_v28  ;;  %v3535_v28 = vpack.c.bf16 %v2980_v25, %v2973_v23 }
 0x808   :  { %v3674_v29 = vpop.eup %3673 }
 0x809   :  { %v3676_v31 = vpop.eup %3675  ;;  %v1279_v33 = vadd.f32 1.0, %v3674_v29 }
 0x80a   :  { %v1278_v34 = vadd.f32 1.0, %v3676_v31 }
 0x80b   :  { %v1281_v36 = vmul.f32 0.5, %v1279_v33 }
 0x80c   :  { %v1280_v38 = vmul.f32 0.5, %v1278_v34 }
 0x80d   :  { %v1283_v40 = vmul.f32 %v1281_v36, %v1263_v15  ;;  %v2989_v15 = vld [vmem:[%s4656_s2 + $0x1e8] sm:$0xff] }
 0x80e   :  { %v1282_v42 = vmul.f32 %v1280_v38, %v1258_v3  ;;  %v2996_v3 = vld [vmem:[%s4656_s2 + $0x228] sm:$0xff] }
 0x80f   :  { %v3547_v19 = vpack.c.bf16 %v2996_v3, %v2989_v15  ;;  %v3001_v15 = vld [vmem:[%s4656_s2 + $0x258] sm:$0xff] }
 0x810   :  { %3320 = vmatprep.mubr.f32.mxu1 %v1282_v42  ;;  %v4267_v42 = vsub.s32 5, %v3855_v51 }
 0x811   :  { %3321 = vmatmul.mubr.f32.vlgmr.msra.gmra.mrb[18].mxu1 %v1283_v40  ;;  %v1399_v40 = vsub.s32 6, %v3855_v51 }
 0x812   :  { %1736 = vmatprep.mubr.f32.mxu1 %v3742_v24  ;;  %3546 = vmatpush1.bf16.msra.mxu1 %v3545_v11 }
 0x813   :  { %3548 = vmatprep.subr.bf16.mxu1 %v3547_v19  ;;  %v1503_v19 = vrot.slane %v3001_v15, %v3858_v53 }
 0x816   :  { %3550 = vmatpush1.bf16.msra.mxu1 %v3549_v22 }
 0x817   :  { %3328 = vmatprep.subr.mxu1 %v3742_v24 }
 0x8e4   :  { %v3322_v39 = vpop.f32.mrb[18].mxu1 }
 0x8e5   :  { %v1360_v30 = vadd.f32 %v3322_v39, %v1287_v43  ;;  %v1354_v44 = vpop.f32.mrb[19].mxu1  ;;  %v1394_v39 = vrot.slane %v3923_v13, %v4267_v42 }
 0x8e6   :  { %v1355_v45 = vadd.f32 %v1354_v44, %v1287_v43  ;;  %v1400_v44 = vrot.slane %v3923_v13, %v1399_v40 }
 0x8e7   :  { %v1364_v32 = vadd.f32 %v1360_v30, %v4143_v41 }
 0x8e8   :  { %v1363_v46 = vadd.f32 %v1355_v45, %v4139_v27  ;;  %v2971_v27 = vld [vmem:[%s4656_s2 + $0x148] sm:$0xff] }
 0x8e9   :  { %v1368_v47 = vsel %vm33_vm0, %v1364_v32, 0.0  ;;  %v3527_v1 = vpack.c.bf16 %v2978_v63, %v2971_v27 }
 0x8ea   :  { %1369 = vadd.xlane.f32.xlu1 %v1368_v47  ;;  %v1365_v49 = vsel %vm33_vm0, %v1363_v46, 0.0 }
 0x8eb   :  { %1366 = vadd.xlane.f32.xlu0 %v1365_v49  ;;  %3528 = vmatprep.subr.bf16.mxu0 %v3527_v1  ;;  %v2987_v49 = vld [vmem:[%s4656_s2 + $0x1d8] sm:$0xff] }
 0x8ec   :  { %3530 = vmatpush1.bf16.msra.mxu0 %v3529_v7 }
 0x8ed   :  { %3532 = vmatprep.subr.bf16.mxu0 %v3531_v16  ;;  %v1491_v16 = vrot.slane %v4331_v8, %v3858_v53 }
 0x8f0   :  { %3534 = vmatpush1.bf16.msra.mxu0 %v3533_v10 }
 0x8f1   :  { %3536 = vmatprep.subr.bf16.mxu0 %v3535_v28 }
 0x977   :  { %v1370_v50 = vpop.xlane.xlu1 %1369 }
 0x978   :  { %v1372_v52 = vmul.f32 0.03125, %v1370_v50  ;;  %v1367_v54 = vpop.xlane.xlu0 %1366  ;;  %v2994_v50 = vld [vmem:[%s4656_s2 + $0x218] sm:$0xff] }
 0x979   :  { %v1371_v56 = vmul.f32 0.03125, %v1367_v54 }
 0x97a   :  { %v1374_v57 = vsub.f32 %v1364_v32, %v1372_v52  ;;  %v2972_v32 = vld [vmem:[%s4656_s2 + $0x150] sm:$0xff] }
 0x97b   :  { %v1373_v58 = vsub.f32 %v1363_v46, %v1371_v56  ;;  %v2979_v46 = vld [vmem:[%s4656_s2 + $0x190] sm:$0xff] }
 0x97c   :  { %v1376_v59 = vmul.f32 %v1374_v57, %v1374_v57  ;;  %v3537_v13 = vpack.c.bf16 %v2979_v46, %v2972_v32 }
 0x97d   :  { %v1375_v60 = vmul.f32 %v1373_v58, %v1373_v58 }
 0x97e   :  { %v1380_v62 = vsel %vm33_vm0, %v1376_v59, 0.0  ;;  %v2986_v59 = vld [vmem:[%s4656_s2 + $0x1d0] sm:$0xff] }
 0x97f   :  { %1381 = vadd.xlane.f32.xlu1 %v1380_v62  ;;  %v1377_v41 = vsel %vm33_vm0, %v1375_v60, 0.0 }
 0x980   :  { %1378 = vadd.xlane.f32.xlu0 %v1377_v41  ;;  %v3002_v41 = vld [vmem:[%s4656_s2 + $0x260] sm:$0xff] }
 0x981   :  { %v1507_v27 = vrot.slane %v3002_v41, %v3858_v53 }
 0xa0c   :  { %v1382_v29 = vpop.xlane.xlu1 %1381 }
 0xa0d   :  { %v1384_v31 = vmul.f32 0.03125, %v1382_v29  ;;  %v1379_v33 = vpop.xlane.xlu0 %1378 }
 0xa0e   :  { %v1383_v34 = vmul.f32 0.03125, %v1379_v33 }
 0xa0f   :  { %v1386_v36 = vadd.f32 1e-05, %v1384_v31 }
 0xa10   :  { %v1385_v38 = vadd.f32 1e-05, %v1383_v34 }
 0xa11   :  { %3677 = vrsqrt.f32 %v1386_v36 }
 0xa12   :  { %3679 = vrsqrt.f32 %v1385_v38 }
 0xa1b   :  { %v3678_v43 = vpop.eup %3677 }
 0xa1c   :  { %v3680_v30 = vpop.eup %3679  ;;  %v1390_v47 = vmul.f32 %v3678_v43, %v1374_v57  ;;  %v2993_v57 = vld [vmem:[%s4656_s2 + $0x210] sm:$0xff] }
 0xa1d   :  { %v1389_v45 = vmul.f32 %v3680_v30, %v1373_v58  ;;  %v3539_v58 = vpack.c.bf16 %v2994_v50, %v2987_v49  ;;  %v3541_v60 = vpack.c.bf16 %v2993_v57, %v2986_v59 }
 0xa1e   :  { %v1396_v56 = vmul.f32 %v1394_v39, %v1390_v47 }
 0xa1f   :  { %v1395_v52 = vmul.f32 %v1394_v39, %v1389_v45 }
 0xa20   :  { %v4301_v62 = vadd.f32 %v1400_v44, %v1396_v56 }
 0xa21   :  { %v4287_v54 = vadd.f32 %v1400_v44, %v1395_v52 }
 0xa23   :  { %3053 = vmatmul.mubr.msk.f32.vlgmr.msra.gmra.mrb[16].mxu0 %vm33_vm0, %v4287_v54  ;;  %3057 = vmatmul.mubr.msk.f32.vlgmr.msra.gmra.mrb[20].mxu1 %vm33_vm0, %v4287_v54 }
 0xa24   :  { %3538 = vmatpush1.bf16.msra.mxu0 %v3537_v13  ;;  %1588 = vmatprep.mubr.f32.mxu0 %v3742_v24 }
 0xa25   :  { %1742 = vmatprep.mubr.f32.mxu1 %v3742_v24  ;;  %3540 = vmatprep.subr.bf16.mxu0 %v3539_v58 }
 0xa27   :  { %3054 = vmatmul.mubr.msk.f32.gmra.mrb[18].mxu0 %vm33_vm0, %v4301_v62  ;;  %3058 = vmatmul.mubr.msk.f32.gmra.mrb[22].mxu1 %vm33_vm0, %v4301_v62 }
 0xa28   :  { %3542 = vmatpush1.bf16.msra.mxu0 %v3541_v60  ;;  %1659 = vmatprep.mubr.f32.mxu0 %v3742_v24 }
 0xa29   :  { %3323 = vmatprep.subr.mxu0 %v3742_v24  ;;  %3330 = vmatprep.mubr.msk.f32.mxu1 %vm3743_vm1, %v3742_v24 }
 0xa2b   :  { %3055 = vmatmul.mubr.msk.f32.vlgmr.msra.gmra.mrb[20].mxu0 %vm33_vm0, %v4287_v54 }
 0xa2c   :  { %1665 = vmatprep.mubr.f32.mxu0 %v3742_v24 }
 0xa2f   :  { %3056 = vmatmul.mubr.msk.f32.gmra.mrb[22].mxu0 %vm33_vm0, %v4301_v62 }
 0xa30   :  { %3325 = vmatprep.mubr.msk.f32.mxu0 %vm3743_vm1, %v3742_v24 }
 0xaf6   :  { %v1584_v63 = vpop.f32.mrb[16].mxu0  ;;  %v1738_v0 = vpop.f32.mrb[20].mxu1 }
 0xaf7   :  { %v1739_v1 = vadd.f32 %v1738_v0, %v1507_v27  ;;  %v1586_v2 = vpop.f32.mrb[17].mxu0  ;;  %v4322_v4 = vpop.f32.mrb[21].mxu1  ;;  %v1585_v20 = vadd.f32 %v1584_v63, %v1491_v16 }
 0xaf8   :  { %v1587_v28 = vadd.f32 %v1586_v2, %v1495_v21 }
 0xaf9   :  { %3329 = vmatpush3.msra.mxu1 %v1739_v1 }
 0xafa   :  { %v1590_v6 = vpop.f32.mrb[18].mxu0  ;;  %v1744_v7 = vpop.f32.mrb[22].mxu1  ;;  %3338 = vmatprep.subr.mxu1 %v3742_v24 }
 0xafb   :  { %v4333_v9 = vadd.f32 %v1744_v7, %v1507_v27  ;;  %v1592_v11 = vpop.f32.mrb[19].mxu0  ;;  %v4335_v12 = vpop.f32.mrb[23].mxu1  ;;  %v1591_v31 = vadd.f32 %v1590_v6, %v1491_v16 }
 0xafc   :  { %v1593_v34 = vadd.f32 %v1592_v11, %v1495_v21  ;;  %v3021_v21 = vld [vmem:[%s4657_s3 + $0x220] sm:$0xff] }
 0xafe   :  { %v1661_v3 = vpop.f32.mrb[20].mxu0 }
 0xaff   :  { %v1662_v18 = vadd.f32 %v1661_v3, %v1499_v14  ;;  %v1663_v10 = vpop.f32.mrb[21].mxu0 }
 0xb00   :  { %v1664_v23 = vadd.f32 %v1663_v10, %v1503_v19 }
 0xb01   :  { %3324 = vmatpush3.xpose.msra.mxu0 %v1662_v18 }
 0xb02   :  { %v1667_v22 = vpop.f32.mrb[22].mxu0  ;;  %3333 = vmatprep.subr.mxu0 %v3742_v24 }
 0xb03   :  { %v1669_v25 = vpop.f32.mrb[23].mxu0  ;;  %v1668_v29 = vadd.f32 %v1667_v22, %v1499_v14  ;;  %v3022_v22 = vld [vmem:[%s4657_s3 + $0x228] sm:$0xff] }
 0xb04   :  { %3326 = vmatmul.mubr.f32.vlgmr.msra.gmra.mrb[24].mxu0 %v1585_v20  ;;  %v1670_v33 = vadd.f32 %v1669_v25, %v1503_v19  ;;  %v3551_v25 = vpack.c.bf16 %v3022_v22, %v3021_v21 }
 0xb05   :  { %3334 = vmatpush3.xpose.msra.mxu0 %v1664_v23  ;;  %3335 = vmatprep.mubr.msk.f32.mxu0 %vm3743_vm1, %v3742_v24  ;;  %v3005_v23 = vld [vmem:[%s4657_s3 + $0x1a0] sm:$0xff] }
 0xb06   :  { %3343 = vmatprep.subr.mxu0 %v3742_v24 }
 0xb08   :  { %3336 = vmatmul.mubr.f32.vlgmr.msra.gmra.mrb[26].mxu0 %v1587_v28  ;;  %v3006_v28 = vld [vmem:[%s4657_s3 + $0x1a8] sm:$0xff] }
 0xb09   :  { %3344 = vmatpush3.xpose.msra.mxu0 %v1668_v29  ;;  %3345 = vmatprep.mubr.msk.f32.mxu0 %vm3743_vm1, %v3742_v24  ;;  %v3023_v29 = vld [vmem:[%s4657_s3 + $0x230] sm:$0xff] }
 0xb0a   :  { %3353 = vmatprep.subr.mxu0 %v3742_v24 }
 0xb0c   :  { %3346 = vmatmul.mubr.f32.vlgmr.msra.gmra.mrb[28].mxu0 %v1591_v31  ;;  %v3024_v31 = vld [vmem:[%s4657_s3 + $0x238] sm:$0xff] }
 0xb0d   :  { %3354 = vmatpush3.xpose.msra.mxu0 %v1670_v33  ;;  %3355 = vmatprep.mubr.msk.f32.mxu0 %vm3743_vm1, %v3742_v24  ;;  %v3553_v33 = vpack.c.bf16 %v3006_v28, %v3005_v23 }
 0xb0e   :  { %3552 = vmatprep.subr.bf16.mxu0 %v3551_v25 }
 0xb10   :  { %3356 = vmatmul.mubr.f32.vlgmr.msra.gmra.mrb[30].mxu0 %v1593_v34  ;;  %v3555_v34 = vpack.c.bf16 %v3024_v31, %v3023_v29 }
 0xb11   :  { %3554 = vmatpush3.bf16.msra.mxu0 %v3553_v33 }
 0xb12   :  { %3556 = vmatprep.subr.bf16.mxu0 %v3555_v34 }
 0xbd7   :  { %v1815_v36 = vpop.f32.mrb[24].mxu0 }
 0xbd8   :  { %v1819_v38 = vmul.f32 0.25, %v1815_v36  ;;  %v3327_v43 = vpop.f32.mrb[25].mxu0  ;;  %v3007_v36 = vld [vmem:[%s4657_s3 + $0x1b0] sm:$0xff] }
 0xbd9   :  { %v3025_v43 = vld [vmem:[%s4657_s3 + $0x240] sm:$0xff] }
 0xbda   :  { %v1820_v39 = vadd.f32 %v1819_v38, %v3960_v48  ;;  %v3008_v38 = vld [vmem:[%s4657_s3 + $0x1b8] sm:$0xff] }
 0xbdb   :  { %v1971_v30 = vpop.f32.mrb[26].mxu0 }
 0xbdc   :  { %v1975_v44 = vmul.f32 0.25, %v1971_v30  ;;  %v3337_v45 = vpop.f32.mrb[27].mxu0  ;;  %v1821_v32 = vsel %vm503_vm4, %v1820_v39, -inf  ;;  %v3557_v30 = vpack.c.bf16 %v3008_v38, %v3007_v36  ;;  %v3019_v38 = vld [vmem:[%s4657_s3 + $0x210] sm:$0xff] }
 0xbdd   :  { %1822 = vmax.xlane.f32.xlu0 %v1821_v32  ;;  %v3009_v45 = vld [vmem:[%s4657_s3 + $0x1c0] sm:$0xff]  ;;  %v3010_v32 = vld [vmem:[%s4657_s3 + $0x1c8] sm:$0xff] }
 0xbde   :  { %v1976_v46 = vadd.f32 %v1975_v44, %v3960_v48  ;;  %3558 = vmatpush3.bf16.msra.mxu0 %v3557_v30 }
 0xbdf   :  { %v2127_v47 = vpop.f32.mrb[28].mxu0 }
 0xbe0   :  { %v2131_v49 = vmul.f32 0.25, %v2127_v47  ;;  %v3347_v50 = vpop.f32.mrb[29].mxu0  ;;  %v1977_v52 = vsel %vm503_vm4, %v1976_v46, -inf  ;;  %v3028_v47 = vld [vmem:[%s4657_s3 + $0x258] sm:$0xff] }
 0xbe1   :  { %1978 = vmax.xlane.f32.xlu1 %v1977_v52  ;;  %v3011_v52 = vld [vmem:[%s4657_s3 + $0x1d0] sm:$0xff] }
 0xbe2   :  { %v2132_v13 = vadd.f32 %v2131_v49, %v3965_v61  ;;  %v3561_v49 = vpack.c.bf16 %v3010_v32, %v3009_v45 }
 0xbe3   :  { %v2283_v56 = vpop.f32.mrb[30].mxu0 }
 0xbe4   :  { %v2287_v58 = vmul.f32 0.25, %v2283_v56  ;;  %v3357_v59 = vpop.f32.mrb[31].mxu0  ;;  %v2133_v57 = vsel %vm503_vm4, %v2132_v13, -inf  ;;  %v3029_v56 = vld [vmem:[%s4657_s3 + $0x260] sm:$0xff] }
 0xbe5   :  { %2134 = vmax.xlane.f32.xlu0 %v2133_v57 }
 0xbe6   :  { %v2288_v60 = vadd.f32 %v2287_v58, %v3965_v61  ;;  %v3030_v58 = vld [vmem:[%s4657_s3 + $0x268] sm:$0xff] }
 0xbe7   :  { %v3567_v57 = vpack.c.bf16 %v3030_v58, %v3029_v56 }
 0xbe8   :  { %v2289_v41 = vsel %vm503_vm4, %v2288_v60, -inf }
 0xbe9   :  { %2290 = vmax.xlane.f32.xlu1 %v2289_v41  ;;  %v3014_v41 = vld [vmem:[%s4657_s3 + $0x1e8] sm:$0xff] }
 0xc6a   :  { %v1823_v48 = vpop.xlane.xlu0 %1822 }
 0xc6b   :  { %v1824_v27 = vsub.f32 %v1820_v39, %v1823_v48  ;;  %v3026_v39 = vld [vmem:[%s4657_s3 + $0x248] sm:$0xff]  ;;  %v3031_v48 = vld [vmem:[%s4657_s3 + $0x270] sm:$0xff] }
 0xc6c   :  { %v3559_v44 = vpack.c.bf16 %v3026_v39, %v3025_v43 }
 0xc6d   :  { %v1825_v63 = vmul.f32 1.442695, %v1824_v27  ;;  %v3032_v27 = vld [vmem:[%s4657_s3 + $0x278] sm:$0xff] }
 0xc6e   :  { %v1979_v0 = vpop.xlane.xlu1 %1978  ;;  %3560 = vmatprep.subr.bf16.mxu0 %v3559_v44 }
 0xc6f   :  { %3681 = vpow2.f32 %v1825_v63  ;;  %v1980_v1 = vsub.f32 %v1976_v46, %v1979_v0  ;;  %v3027_v46 = vld [vmem:[%s4657_s3 + $0x250] sm:$0xff]  ;;  %3562 = vmatpush3.bf16.msra.mxu0 %v3561_v49  ;;  %v3571_v0 = vpack.c.bf16 %v3032_v27, %v3031_v48 }
 0xc70   :  { %v3563_v50 = vpack.c.bf16 %v3028_v47, %v3027_v46 }
 0xc71   :  { %v1981_v2 = vmul.f32 1.442695, %v1980_v1  ;;  %v3015_v1 = vld [vmem:[%s4657_s3 + $0x1f0] sm:$0xff] }
 0xc72   :  { %v2135_v5 = vpop.xlane.xlu0 %2134  ;;  %3564 = vmatprep.subr.bf16.mxu0 %v3563_v50  ;;  %v2376_v50 = vrot.slane %v4331_v8, %v3864_v55 }
 0xc73   :  { %3683 = vpow2.f32 %v1981_v2  ;;  %v2136_v6 = vsub.f32 %v2132_v13, %v2135_v5  ;;  %v3012_v13 = vld [vmem:[%s4657_s3 + $0x1d8] sm:$0xff]  ;;  %v3033_v5 = vld [vmem:[%s4657_s3 + $0x280] sm:$0xff] }
 0xc74   :  { %v3565_v59 = vpack.c.bf16 %v3012_v13, %v3011_v52  ;;  %v3016_v2 = vld [vmem:[%s4657_s3 + $0x1f8] sm:$0xff] }
 0xc75   :  { %v2137_v7 = vmul.f32 1.442695, %v2136_v6  ;;  %v3034_v6 = vld [vmem:[%s4657_s3 + $0x288] sm:$0xff] }
 0xc76   :  { %v2291_v11 = vpop.xlane.xlu1 %2290  ;;  %3566 = vmatpush3.bf16.msra.mxu0 %v3565_v59 }
 0xc77   :  { %3685 = vpow2.f32 %v2137_v7  ;;  %v2292_v14 = vsub.f32 %v2288_v60, %v2291_v11  ;;  %v3013_v60 = vld [vmem:[%s4657_s3 + $0x1e0] sm:$0xff]  ;;  %3568 = vmatprep.subr.bf16.mxu0 %v3567_v57  ;;  %v3573_v7 = vpack.c.bf16 %v3016_v2, %v3015_v1  ;;  %v3575_v11 = vpack.c.bf16 %v3034_v6, %v3033_v5 }
 0xc78   :  { %v3569_v63 = vpack.c.bf16 %v3014_v41, %v3013_v60 }
 0xc79   :  { %v4365_v15 = vpop.eup %3681  ;;  %v2293_v61 = vmul.f32 1.442695, %v2292_v14  ;;  %v3017_v14 = vld [vmem:[%s4657_s3 + $0x200] sm:$0xff] }
 0xc7a   :  { %v1827_v16 = vsel %vm503_vm4, %v4365_v15, 0.0  ;;  %3570 = vmatpush3.bf16.msra.mxu0 %v3569_v63 }
 0xc7b   :  { %3687 = vpow2.f32 %v2293_v61  ;;  %1828 = vadd.xlane.f32.xlu0 %v1827_v16  ;;  %3572 = vmatprep.subr.bf16.mxu0 %v3571_v0  ;;  %v3018_v61 = vld [vmem:[%s4657_s3 + $0x208] sm:$0xff] }
 0xc7c   :  { %v3577_v16 = vpack.c.bf16 %v3018_v61, %v3017_v14  ;;  %v2983_v61 = vld [vmem:[%s4656_s2 + $0x1b0] sm:$0xff] }
 0xc7d   :  { %v4369_v3 = vpop.eup %3683 }
 0xc7e   :  { %v1983_v17 = vsel %vm503_vm4, %v4369_v3, 0.0  ;;  %3574 = vmatpush3.bf16.msra.mxu0 %v3573_v7 }
 0xc7f   :  { %1984 = vadd.xlane.f32.xlu1 %v1983_v17  ;;  %3576 = vmatprep.subr.bf16.mxu0 %v3575_v11 }
 0xc81   :  { %v4373_v18 = vpop.eup %3685 }
 0xc82   :  { %v2139_v19 = vsel %vm503_vm4, %v4373_v18, 0.0  ;;  %3578 = vmatpush3.bf16.msra.mxu0 %v3577_v16 }
 0xc83   :  { %2140 = vadd.xlane.f32.xlu0 %v2139_v19 }
 0xc85   :  { %v4377_v10 = vpop.eup %3687 }
 0xc86   :  { %v2295_v20 = vsel %vm503_vm4, %v4377_v10, 0.0 }
 0xc87   :  { %2296 = vadd.xlane.f32.xlu1 %v2295_v20  ;;  %v3003_v20 = vld [vmem:[%s4656_s2 + $0x268] sm:$0xff] }
 0xc88   :  { %v1511_v22 = vrot.slane %v3003_v20, %v3858_v53 }
 0xc8a   :  { %v1741_v29 = vadd.f32 %v4322_v4, %v1511_v22 }
 0xd08   :  { %v1829_v17 = vpop.xlane.xlu0 %1828 }
 0xd09   :  { %3689 = vrcp.f32 %v1829_v17  ;;  %v2990_v17 = vld [vmem:[%s4656_s2 + $0x1f0] sm:$0xff] }
 0xd0c   :  { %v1985_v19 = vpop.xlane.xlu1 %1984 }
 0xd0d   :  { %3691 = vrcp.f32 %v1985_v19  ;;  %v2997_v19 = vld [vmem:[%s4656_s2 + $0x230] sm:$0xff] }
 0xd0e   :  { %v3587_v20 = vpack.c.bf16 %v2997_v19, %v2990_v17 }
 0xd10   :  { %v2141_v21 = vpop.xlane.xlu0 %2140 }
 0xd11   :  { %3693 = vrcp.f32 %v2141_v21 }
 0xd13   :  { %v3690_v23 = vpop.eup %3689 }
 0xd14   :  { %v1831_v25 = vmul.f32 %v3690_v23, %v4365_v15  ;;  %v2297_v28 = vpop.xlane.xlu1 %2296  ;;  %v1747_v15 = vadd.f32 %v4335_v12, %v1511_v22 }
 0xd15   :  { %3695 = vrcp.f32 %v2297_v28 }
 0xd16   :  { %3331 = vmatmul.mubr.msk.f32.vlgmr.msra.gmra.mrb[24].mxu1 %vm503_vm4, %v1831_v25 }
 0xd17   :  { %v3692_v31 = vpop.eup %3691  ;;  %3339 = vmatpush3.msra.mxu1 %v1741_v29  ;;  %3340 = vmatprep.mubr.msk.f32.mxu1 %vm3743_vm1, %v3742_v24 }
 0xd18   :  { %v1987_v33 = vmul.f32 %v3692_v31, %v4369_v3  ;;  %3348 = vmatprep.subr.mxu1 %v3742_v24  ;;  %v2483_v31 = vrot.slane %v4331_v8, %v4130_v35 }
 0xd1a   :  { %3341 = vmatmul.mubr.msk.f32.vlgmr.msra.gmra.mrb[26].mxu1 %vm503_vm4, %v1987_v33 }
 0xd1b   :  { %v3694_v34 = vpop.eup %3693  ;;  %3349 = vmatpush3.msra.mxu1 %v4333_v9  ;;  %3350 = vmatprep.mubr.msk.f32.mxu1 %vm3743_vm1, %v3742_v24  ;;  %v3035_v9 = vld [vmem:[%s4657_s3 + $0x290] sm:$0xff] }
 0xd1c   :  { %v2143_v4 = vmul.f32 %v3694_v34, %v4373_v18  ;;  %3358 = vmatprep.subr.mxu1 %v3742_v24  ;;  %v3036_v18 = vld [vmem:[%s4657_s3 + $0x298] sm:$0xff] }
 0xd1d   :  { %v3579_v12 = vpack.c.bf16 %v3036_v18, %v3035_v9 }
 0xd1e   :  { %3351 = vmatmul.mubr.msk.f32.vlgmr.msra.gmra.mrb[28].mxu1 %vm503_vm4, %v2143_v4  ;;  %v2489_v4 = vrot.slane %v4331_v8, %v4133_v37 }
 0xd1f   :  { %v3696_v36 = vpop.eup %3695  ;;  %3359 = vmatpush3.msra.mxu1 %v1747_v15  ;;  %3360 = vmatprep.mubr.msk.f32.mxu1 %vm3743_vm1, %v3742_v24  ;;  %v3020_v24 = vld [vmem:[%s4657_s3 + $0x218] sm:$0xff] }
 0xd20   :  { %v2299_v3 = vmul.f32 %v3696_v36, %v4377_v10  ;;  %v3581_v10 = vpack.c.bf16 %v3020_v24, %v3019_v38  ;;  %3580 = vmatprep.subr.bf16.mxu0 %v3579_v12  ;;  %v3037_v38 = vld [vmem:[%s4657_s3 + $0x2a0] sm:$0xff]  ;;  %v3038_v24 = vld [vmem:[%s4657_s3 + $0x2a8] sm:$0xff] }
 0xd22   :  { %3361 = vmatmul.mubr.msk.f32.vlgmr.msra.gmra.mrb[30].mxu1 %vm503_vm4, %v2299_v3  ;;  %3582 = vmatpush3.bf16.msra.mxu0 %v3581_v10  ;;  %v3591_v10 = vpack.c.bf16 %v3038_v24, %v3037_v38 }
 0xde9   :  { %v1901_v43 = vpop.f32.mrb[24].mxu1 }
 0xdea   :  { %v3332_v39 = vpop.f32.mrb[25].mxu1 }
 0xdeb   :  { %v3040_v39 = vld [vmem:[%s4657_s3 + $0x2b8] sm:$0xff] }
 0xded   :  { %v2057_v30 = vpop.f32.mrb[26].mxu1 }
 0xdee   :  { %v3342_v44 = vpop.f32.mrb[27].mxu1  ;;  %2441 = vmatprep.mubr.f32.mxu0 %v2057_v30 }
 0xdef   :  { %2442 = vmatmul.mubr.f32.vlgmr.msra.gmra.mrb[32].mxu0 %v1901_v43  ;;  %v3039_v43 = vld [vmem:[%s4657_s3 + $0x2b0] sm:$0xff]  ;;  %v3041_v44 = vld [vmem:[%s4657_s3 + $0x2c0] sm:$0xff] }
 0xdf0   :  { %v3595_v30 = vpack.c.bf16 %v3040_v39, %v3039_v43 }
 0xdf1   :  { %v2213_v45 = vpop.f32.mrb[28].mxu1 }
 0xdf2   :  { %v3352_v32 = vpop.f32.mrb[29].mxu1 }
 0xdf5   :  { %v2369_v46 = vpop.f32.mrb[30].mxu1 }
 0xdf6   :  { %v3362_v47 = vpop.f32.mrb[31].mxu1  ;;  %2446 = vmatprep.mubr.f32.mxu0 %v2369_v46  ;;  %v3043_v46 = vld [vmem:[%s4657_s3 + $0x2d0] sm:$0xff] }
 0xdf7   :  { %2447 = vmatmul.mubr.f32.gmra.mrb[34].mxu0 %v2213_v45  ;;  %v3042_v45 = vld [vmem:[%s4657_s3 + $0x2c8] sm:$0xff]  ;;  %v3044_v47 = vld [vmem:[%s4657_s3 + $0x2d8] sm:$0xff] }
 0xdf8   :  { %v3599_v32 = vpack.c.bf16 %v3042_v45, %v3041_v44 }
 0xec2   :  { %v3195_v49 = vpop.f32.mrb[32].mxu0 }
 0xec3   :  { %v3196_v52 = vpop.f32.mrb[33].mxu0 }
 0xec4   :  { %v3197_v13 = vadd.f32 %v3196_v52, %v3195_v49  ;;  %v3603_v49 = vpack.c.bf16 %v3044_v47, %v3043_v46  ;;  %v3046_v52 = vld [vmem:[%s4657_s3 + $0x2e8] sm:$0xff] }
 0xec6   :  { %v2444_v56 = vadd.f32 %v3197_v13, %v2376_v50  ;;  %v3047_v13 = vld [vmem:[%s4657_s3 + $0x2f0] sm:$0xff] }
 0xec8   :  { %v2452_v58 = vadd.f32 %v2444_v56, %v4287_v54 }
 0xeca   :  { %v3198_v59 = vpop.f32.mrb[34].mxu0  ;;  %v2454_v57 = vsel %vm33_vm0, %v2452_v58, 0.0 }
 0xecb   :  { %v3199_v60 = vpop.f32.mrb[35].mxu0  ;;  %2455 = vadd.xlane.f32.xlu0 %v2454_v57  ;;  %v3049_v57 = vld [vmem:[%s4657_s3 + $0x300] sm:$0xff] }
 0xecc   :  { %v3200_v41 = vadd.f32 %v3199_v60, %v3198_v59  ;;  %v3050_v60 = vld [vmem:[%s4657_s3 + $0x308] sm:$0xff] }
 0xece   :  { %v2449_v48 = vadd.f32 %v3200_v41, %v2376_v50  ;;  %v3045_v50 = vld [vmem:[%s4657_s3 + $0x2e0] sm:$0xff]  ;;  %v3615_v41 = vpack.c.bf16 %v3050_v60, %v3049_v57 }
 0xecf   :  { %v3607_v56 = vpack.c.bf16 %v3046_v52, %v3045_v50  ;;  %v162_v52 = vld [vmem:[%s4657_s3 + $0x190] sm:$0xff] }
 0xed0   :  { %v2453_v27 = vadd.f32 %v2449_v48, %v4301_v62  ;;  %v2976_v62 = vld [vmem:[%s4656_s2 + $0x170] sm:$0xff] }
 0xed1   :  { %v3583_v16 = vpack.c.bf16 %v2983_v61, %v2976_v62  ;;  %v3051_v48 = vld [vmem:[%s4657_s3 + $0x310] sm:$0xff] }
 0xed2   :  { %v2457_v63 = vsel %vm33_vm0, %v2453_v27, 0.0 }
 0xed3   :  { %2458 = vadd.xlane.f32.xlu1 %v2457_v63  ;;  %3584 = vmatprep.subr.bf16.mxu1 %v3583_v16 }
 0xed4   :  { %3586 = vmatpush3.bf16.msra.mxu1 %v3583_v16 }
 0xed5   :  { %3588 = vmatprep.subr.bf16.mxu1 %v3587_v20 }
 0xed8   :  { %3590 = vmatpush3.bf16.msra.mxu1 %v3587_v20 }
 0xed9   :  { %3592 = vmatprep.subr.bf16.mxu1 %v3591_v10 }
 0xf58   :  { %v2456_v0 = vpop.xlane.xlu0 %2455 }
 0xf59   :  { %v2460_v1 = vmul.f32 0.03125, %v2456_v0  ;;  %v3004_v0 = vld [vmem:[%s4656_s2 + $0x270] sm:$0xff] }
 0xf5b   :  { %v2462_v55 = vsub.f32 %v2452_v58, %v2460_v1  ;;  %v3048_v58 = vld [vmem:[%s4657_s3 + $0x2f8] sm:$0xff]  ;;  %v2495_v1 = vrot.slane %v3004_v0, %v3858_v53 }
 0xf5c   :  { %v3611_v59 = vpack.c.bf16 %v3048_v58, %v3047_v13  ;;  %v163_v13 = vld [vmem:[%s4657_s3 + $0x198] sm:$0xff] }
 0xf5d   :  { %v2464_v2 = vmul.f32 %v2462_v55, %v2462_v55 }
 0xf5f   :  { %v2466_v5 = vsel %vm33_vm0, %v2464_v2, 0.0 }
 0xf60   :  { %v2459_v6 = vpop.xlane.xlu1 %2458  ;;  %2467 = vadd.xlane.f32.xlu0 %v2466_v5 }
 0xf61   :  { %v2461_v54 = vmul.f32 0.03125, %v2459_v6 }
 0xf63   :  { %v2463_v7 = vsub.f32 %v2453_v27, %v2461_v54  ;;  %v3052_v27 = vld [vmem:[%s4657_s3 + $0x318] sm:$0xff] }
 0xf64   :  { %v3619_v63 = vpack.c.bf16 %v3052_v27, %v3051_v48  ;;  %v2705_v27 = vrot.slane %v4331_v8, %v4267_v42 }
 0xf65   :  { %v2465_v11 = vmul.f32 %v2463_v7, %v2463_v7 }
 0xf67   :  { %v2469_v14 = vsel %vm33_vm0, %v2465_v11, 0.0 }
 0xf68   :  { %2470 = vadd.xlane.f32.xlu1 %v2469_v14 }
 0xfed   :  { %v2468_v21 = vpop.xlane.xlu0 %2467 }
 0xfee   :  { %v2472_v22 = vmul.f32 0.03125, %v2468_v21 }
 0xff0   :  { %v2474_v23 = vadd.f32 1e-05, %v2472_v22 }
 0xff2   :  { %3697 = vrsqrt.f32 %v2474_v23 }
 0xff5   :  { %v2471_v25 = vpop.xlane.xlu1 %2470 }
 0xff6   :  { %v2473_v28 = vmul.f32 0.03125, %v2471_v25 }
 0xff8   :  { %v2475_v29 = vadd.f32 1e-05, %v2473_v28 }
 0xffa   :  { %3699 = vrsqrt.f32 %v2475_v29 }
 0xffc   :  { %v3698_v33 = vpop.eup %3697 }
 0xffd   :  { %v2478_v34 = vmul.f32 %v3698_v33, %v2462_v55  ;;  %v2598_v33 = vrot.slane %v4331_v8, %v4201_v26 }
 0xfff   :  { %v2484_v15 = vmul.f32 %v2483_v31, %v2478_v34 }
0x1001   :  { %v4524_v36 = vadd.f32 %v2489_v4, %v2484_v15 }
0x1003   :  { %3371 = vmatprep.mubr.msk.f32.mxu1 %vm33_vm0, %v4524_v36 }
0x1004   :  { %v3700_v3 = vpop.eup %3699 }
0x1005   :  { %v2479_v9 = vmul.f32 %v3700_v3, %v2463_v7 }
0x1007   :  { %v2485_v18 = vmul.f32 %v2483_v31, %v2479_v9 }
0x1009   :  { %v4528_v12 = vadd.f32 %v2489_v4, %v2485_v18 }
0x100b   :  { %3372 = vmatmul.mubr.msk.f32.vlgmr.msra.gmra.mrb[32].mxu1 %vm33_vm0, %v4528_v12 }
0x100c   :  { %3594 = vmatpush3.bf16.msra.mxu1 %v3591_v10 }
0x100d   :  { %3596 = vmatprep.subr.bf16.mxu1 %v3595_v30 }
0x1010   :  { %3598 = vmatpush3.bf16.msra.mxu1 %v3595_v30 }
0x1011   :  { %3600 = vmatprep.subr.bf16.mxu1 %v3599_v32 }
0x1014   :  { %3602 = vmatpush3.bf16.msra.mxu1 %v3599_v32 }
0x1015   :  { %3604 = vmatprep.subr.bf16.mxu1 %v3603_v49 }
0x1018   :  { %3606 = vmatpush3.bf16.msra.mxu1 %v3603_v49  ;;  %v161_v49 = vld [vmem:[%s4657_s3 + $0x188] sm:$0xff] }
0x1019   :  { %3608 = vmatprep.subr.bf16.mxu1 %v3607_v56 }
0x101c   :  { %3610 = vmatpush3.bf16.msra.mxu1 %v3607_v56  ;;  %v3627_v56 = vpack.c.bf16 %v163_v13, %v162_v52 }
0x101d   :  { %3612 = vmatprep.subr.bf16.mxu1 %v3611_v59 }
0x1020   :  { %3614 = vmatpush3.bf16.msra.mxu1 %v3611_v59 }
0x1021   :  { %3616 = vmatprep.subr.bf16.mxu1 %v3615_v41 }
0x1024   :  { %3618 = vmatpush3.bf16.msra.mxu1 %v3615_v41 }
0x1025   :  { %3620 = vmatprep.subr.bf16.mxu1 %v3619_v63 }
0x1028   :  { %3622 = vmatpush3.bf16.msra.mxu1 %v3619_v63 }
0x10de   :  { %v3373_v55 = vpop.f32.mrb[32].mxu1 }
0x10df   :  { %v2574_v2 = vadd.f32 %v3373_v55, %v2495_v1  ;;  %v2568_v5 = vpop.f32.mrb[33].mxu1 }
0x10e0   :  { %v2569_v6 = vadd.f32 %v2568_v5, %v2495_v1 }
0x10e1   :  { %v2578_v54 = vmul.f32 %v2574_v2, %v2574_v2 }
0x10e2   :  { %v2577_v7 = vmul.f32 %v2569_v6, %v2569_v6 }
0x10e3   :  { %v2580_v11 = vmul.f32 %v2578_v54, %v2574_v2 }
0x10e4   :  { %v2579_v14 = vmul.f32 %v2577_v7, %v2569_v6 }
0x10e5   :  { %v2582_v62 = vmul.f32 0.044715, %v2580_v11  ;;  %v4614_v11 = vld [vmem:[%s4658_s4 + $0x8] sm:$0xff] }
0x10e6   :  { %v2581_v61 = vmul.f32 0.044715, %v2579_v14  ;;  %v2717_v14 = vrot.slane %v4614_v11, %v4130_v35 }
0x10e7   :  { %v2584_v16 = vadd.f32 %v2582_v62, %v2574_v2 }
0x10e8   :  { %v2583_v17 = vadd.f32 %v2581_v61, %v2569_v6 }
0x10e9   :  { %v2586_v19 = vmul.f32 0.7978846, %v2584_v16 }
0x10ea   :  { %v2585_v20 = vmul.f32 0.7978846, %v2583_v17 }
0x10eb   :  { %3701 = vtanh.f32 %v2586_v19 }
0x10ec   :  { %3703 = vtanh.f32 %v2585_v20 }
0x10f5   :  { %v3702_v21 = vpop.eup %3701 }
0x10f6   :  { %v3704_v22 = vpop.eup %3703  ;;  %v2590_v23 = vadd.f32 1.0, %v3702_v21 }
0x10f7   :  { %v2589_v53 = vadd.f32 1.0, %v3704_v22 }
0x10f8   :  { %v2592_v25 = vmul.f32 0.5, %v2590_v23 }
0x10f9   :  { %v2591_v28 = vmul.f32 0.5, %v2589_v53 }
0x10fa   :  { %v2594_v31 = vmul.f32 %v2592_v25, %v2574_v2  ;;  %v2711_v2 = vrot.slane %v4331_v8, %v1399_v40 }
0x10fb   :  { %v2593_v29 = vmul.f32 %v2591_v28, %v2569_v6 }
0x10fd   :  { %3406 = vmatprep.mubr.f32.mxu1 %v2593_v29 }
0x10fe   :  { %3407 = vmatmul.mubr.f32.vlgmr.msra.gmra.mrb[34].mxu1 %v2594_v31 }
0x11d1   :  { %v3408_v34 = vpop.f32.mrb[34].mxu1 }
0x11d2   :  { %v2671_v4 = vadd.f32 %v3408_v34, %v2598_v33  ;;  %v2665_v15 = vpop.f32.mrb[35].mxu1 }
0x11d3   :  { %v2666_v3 = vadd.f32 %v2665_v15, %v2598_v33 }
0x11d4   :  { %v2675_v9 = vadd.f32 %v2671_v4, %v4528_v12 }
0x11d5   :  { %v2674_v18 = vadd.f32 %v2666_v3, %v4524_v36  ;;  %v160_v36 = vld [vmem:[%s4657_s3 + $0x180] sm:$0xff] }
0x11d6   :  { %v2679_v38 = vsel %vm33_vm0, %v2675_v9, 0.0  ;;  %v3623_v50 = vpack.c.bf16 %v161_v49, %v160_v36  ;;  %v96_v36 = vld [vmem:[%s4656_s2 + $0xb8] sm:$0xff] }
0x11d7   :  { %2680 = vadd.xlane.f32.xlu1 %v2679_v38  ;;  %v2676_v24 = vsel %vm33_vm0, %v2674_v18, 0.0  ;;  %v104_v49 = vld [vmem:[%s4656_s2 + $0xf8] sm:$0xff] }
0x11d8   :  { %2677 = vadd.xlane.f32.xlu0 %v2676_v24  ;;  %3624 = vmatprep.subr.bf16.mxu0 %v3623_v50 }
0x11d9   :  { %3626 = vmatpush3.bf16.msra.mxu0 %v3623_v50  ;;  %v3635_v50 = vpack.c.bf16 %v104_v49, %v96_v36 }
0x11da   :  { %3628 = vmatprep.subr.bf16.mxu0 %v3627_v56 }
0x11dd   :  { %3630 = vmatpush3.bf16.msra.mxu0 %v3627_v56 }
0x1264   :  { %v2681_v10 = vpop.xlane.xlu1 %2680 }
0x1265   :  { %v2683_v43 = vmul.f32 0.03125, %v2681_v10  ;;  %v2678_v39 = vpop.xlane.xlu0 %2677 }
0x1266   :  { %v2682_v30 = vmul.f32 0.03125, %v2678_v39 }
0x1267   :  { %v2685_v44 = vsub.f32 %v2675_v9, %v2683_v43 }
0x1268   :  { %v2684_v45 = vsub.f32 %v2674_v18, %v2682_v30 }
0x1269   :  { %v2687_v32 = vmul.f32 %v2685_v44, %v2685_v44 }
0x126a   :  { %v2686_v46 = vmul.f32 %v2684_v45, %v2684_v45 }
0x126b   :  { %v2691_v47 = vsel %vm33_vm0, %v2687_v32, 0.0 }
0x126c   :  { %2692 = vadd.xlane.f32.xlu1 %v2691_v47  ;;  %v2688_v12 = vsel %vm33_vm0, %v2686_v46, 0.0  ;;  %v80_v46 = vld [vmem:[%s4656_s2 + $0x38] sm:$0xff] }
0x126d   :  { %2689 = vadd.xlane.f32.xlu0 %v2688_v12  ;;  %v88_v47 = vld [vmem:[%s4656_s2 + $0x78] sm:$0xff]  ;;  %s3745_s2 = smov [#allocation2]  }
0x126e   :  { %v3631_v12 = vpack.c.bf16 %v88_v47, %v80_v46  ;;  %s2947_s28 = sshll.u32 %s3745_s2, 4  ;;  %s2948_s28 = int_to_ptr.vmem [resolvable:$true] %s2947_s28 }
0x126f   :  { %s3718_s29 = scalar_lea.vmem %s2948_s28, 256  ;;  %p3723_p1 = scmp.lt.s32.totalorder %s2948_s28, %s2948_s28 }
0x1270   :  { %3632 = vmatprep.subr.bf16.mxu0 %v3631_v12  ;;  %p3719_p0 = scmp.ne.s32.totalorder %s2948_s28, %s3718_s29  ;;  %p3724_p2 = scmp.lt.s32.totalorder %s3718_s29, %s3718_s29 }
0x1272   :  { %p3725_p3 = por %p3724_p2, %p3723_p1 }
0x1274   :  { %p3726_p4 = pnand %p3725_p3, %p3719_p0 }
0x12f9   :  { %v2693_v58 = vpop.xlane.xlu1 %2692 }
0x12fa   :  { %v2695_v59 = vmul.f32 0.03125, %v2693_v58  ;;  %v2690_v57 = vpop.xlane.xlu0 %2689 }
0x12fb   :  { %v2694_v60 = vmul.f32 0.03125, %v2690_v57 }
0x12fc   :  { %v2697_v41 = vadd.f32 1e-05, %v2695_v59 }
0x12fd   :  { %v2696_v48 = vadd.f32 1e-05, %v2694_v60  ;;  %v2846_v60 = vrot.slane %v4614_v11, %v4133_v37 }
0x12fe   :  { %3705 = vrsqrt.f32 %v2697_v41 }
0x12ff   :  { %3707 = vrsqrt.f32 %v2696_v48 }
0x1308   :  { %v3706_v63 = vpop.eup %3705 }
0x1309   :  { %v3708_v0 = vpop.eup %3707  ;;  %v2701_v1 = vmul.f32 %v3706_v63, %v2685_v44 }
0x130a   :  { %v2700_v55 = vmul.f32 %v3708_v0, %v2684_v45  ;;  %v2852_v0 = vrot.slane %v4614_v11, %v4201_v26 }
0x130b   :  { %v2707_v5 = vmul.f32 %v2705_v27, %v2701_v1 }
0x130c   :  { %v2706_v6 = vmul.f32 %v2705_v27, %v2700_v55 }
0x130d   :  { %v2713_v7 = vadd.f32 %v2711_v2, %v2707_v5 }
0x130e   :  { %v2712_v54 = vadd.f32 %v2711_v2, %v2706_v6  ;;  %v2858_v6 = vrot.slane %v4614_v11, %v4267_v42 }
0x1310   :  { %3417 = vmatprep.mubr.msk.f32.mxu0 %vm33_vm0, %v2712_v54 }
0x1311   :  { %3418 = vmatmul.mubr.msk.f32.vlgmr.msra.gmra.mrb[36].mxu0 %vm33_vm0, %v2713_v7 }
0x1312   :  { %3634 = vmatpush3.bf16.msra.mxu0 %v3631_v12 }
0x1313   :  { %3636 = vmatprep.subr.bf16.mxu0 %v3635_v50 }
0x1316   :  { %3638 = vmatpush3.bf16.msra.mxu0 %v3635_v50 }
0x13e4   :  { %v3419_v62 = vpop.f32.mrb[36].mxu0 }
0x13e5   :  { %v2796_v51 = vadd.f32 %v3419_v62, %v2717_v14  ;;  %v2790_v61 = vpop.f32.mrb[37].mxu0 }
0x13e6   :  { %v2791_v40 = vadd.f32 %v2790_v61, %v2717_v14 }
0x13e7   :  { %v2800_v8 = vmul.f32 %v2796_v51, %v2796_v51 }
0x13e8   :  { %v2799_v16 = vmul.f32 %v2791_v40, %v2791_v40 }
0x13e9   :  { %v2802_v17 = vmul.f32 %v2800_v8, %v2796_v51 }
0x13ea   :  { %v2801_v19 = vmul.f32 %v2799_v16, %v2791_v40 }
0x13eb   :  { %v2804_v20 = vmul.f32 0.044715, %v2802_v17 }
0x13ec   :  { %v2803_v21 = vmul.f32 0.044715, %v2801_v19 }
0x13ed   :  { %v2806_v22 = vadd.f32 %v2804_v20, %v2796_v51 }
0x13ee   :  { %v2805_v23 = vadd.f32 %v2803_v21, %v2791_v40 }
0x13ef   :  { %v2808_v53 = vmul.f32 0.7978846, %v2806_v22 }
0x13f0   :  { %v2807_v25 = vmul.f32 0.7978846, %v2805_v23 }
0x13f1   :  { %3709 = vtanh.f32 %v2808_v53 }
0x13f2   :  { %3711 = vtanh.f32 %v2807_v25 }
0x13fb   :  { %v3710_v28 = vpop.eup %3709 }
0x13fc   :  { %v3712_v29 = vpop.eup %3711  ;;  %v2812_v31 = vadd.f32 1.0, %v3710_v28 }
0x13fd   :  { %v2811_v35 = vadd.f32 1.0, %v3712_v29 }
0x13fe   :  { %v2814_v33 = vmul.f32 0.5, %v2812_v31 }
0x13ff   :  { %v2813_v34 = vmul.f32 0.5, %v2811_v35 }
0x1400   :  { %v2816_v4 = vmul.f32 %v2814_v33, %v2796_v51 }
0x1401   :  { %v2815_v15 = vmul.f32 %v2813_v34, %v2791_v40 }
0x1402   :  { %v2820_v3 = vsel %vm33_vm0, %v2816_v4, 0.0 }
0x1403   :  { %2821 = vadd.xlane.f32.xlu1 %v2820_v3  ;;  %v2817_v9 = vsel %vm33_vm0, %v2815_v15, 0.0 }
0x1404   :  { %2818 = vadd.xlane.f32.xlu0 %v2817_v9 }
0x1490   :  { %v2822_v18 = vpop.xlane.xlu1 %2821 }
0x1491   :  { %v2824_v38 = vmul.f32 0.03125, %v2822_v18  ;;  %v2819_v24 = vpop.xlane.xlu0 %2818 }
0x1492   :  { %v2823_v10 = vmul.f32 0.03125, %v2819_v24 }
0x1493   :  { %v2826_v43 = vsub.f32 %v2816_v4, %v2824_v38 }
0x1494   :  { %v2825_v39 = vsub.f32 %v2815_v15, %v2823_v10 }
0x1495   :  { %v2828_v30 = vmul.f32 %v2826_v43, %v2826_v43 }
0x1496   :  { %v2827_v44 = vmul.f32 %v2825_v39, %v2825_v39 }
0x1497   :  { %v2832_v45 = vsel %vm33_vm0, %v2828_v30, 0.0 }
0x1498   :  { %2833 = vadd.xlane.f32.xlu1 %v2832_v45  ;;  %v2829_v32 = vsel %vm33_vm0, %v2827_v44, 0.0 }
0x1499   :  { %2830 = vadd.xlane.f32.xlu0 %v2829_v32 }
0x1525   :  { %v2834_v52 = vpop.xlane.xlu1 %2833 }
0x1526   :  { %v2836_v13 = vmul.f32 0.03125, %v2834_v52  ;;  %v2831_v56 = vpop.xlane.xlu0 %2830 }
0x1527   :  { %v2835_v58 = vmul.f32 0.03125, %v2831_v56 }
0x1528   :  { %v2838_v59 = vadd.f32 1e-05, %v2836_v13 }
0x1529   :  { %v2837_v57 = vadd.f32 1e-05, %v2835_v58 }
0x152a   :  { %3713 = vrsqrt.f32 %v2838_v59 }
0x152b   :  { %3715 = vrsqrt.f32 %v2837_v57 }
0x1534   :  { %v3714_v41 = vpop.eup %3713 }
0x1535   :  { %v3716_v48 = vpop.eup %3715  ;;  %v2842_v27 = vmul.f32 %v3714_v41, %v2826_v43 }
0x1536   :  { %v2841_v63 = vmul.f32 %v3716_v48, %v2825_v39 }
0x1537   :  { %v2848_v1 = vmul.f32 %v2846_v60, %v2842_v27 }
0x1538   :  { %v2847_v55 = vmul.f32 %v2846_v60, %v2841_v63 }
0x1539   :  { %v2854_v5 = vadd.f32 %v2852_v0, %v2848_v1 }
0x153a   :  { %v2853_v2 = vadd.f32 %v2852_v0, %v2847_v55 }
0x153c   :  { %3428 = vmatprep.mubr.msk.f32.mxu0 %vm33_vm0, %v2853_v2 }
0x153d   :  { %3429 = vmatmul.mubr.msk.f32.vlgmr.msra.gmra.mrb[38].mxu0 %vm33_vm0, %v2854_v5 }
0x1610   :  { %v3430_v37 = vpop.f32.mrb[38].mxu0 }
0x1611   :  { %v2937_v54 = vadd.f32 %v3430_v37, %v2858_v6  ;;  %v2931_v7 = vpop.f32.mrb[39].mxu0 }
0x1612   :  { %v2932_v14 = vadd.f32 %v2931_v7, %v2858_v6 }
0x1613   :  { %2941 = vst [vmem:[#allocation2 + $0x8] sm:$0xff] %v2937_v54 }
0x1614   :  { %2940 = vst [vmem:[#allocation2] sm:$0xff] %v2932_v14 }
0x1615   :  { %3729 = shalt.err (!%p3726_p4)
}
0x1616   :  { %s3730_s7 = scalar_lea.hbm %s4659_s5, 256 }
0x1617   :  { %p3731_p5 = scmp.ne.s32.totalorder %s4659_s5, %s3730_s7  ;;  %p3734_p6 = scmp.lt.u32.totalorder %s3730_s7, %s4659_s5 }
0x1619   :  { %p3736_p7 = pnand %p3734_p6, %p3731_p5 }
0x161b   :  { %3739 = shalt.err (!%p3736_p7)
}
0x161c   :  { %s3746_s11 = smov 128   ;;  %s3747_s12 = smov 8  }
0x161d   :  { %2953 = dma.vmem_to_hbm [thread:$0]  %s2948_s28, 256, %s4659_s5, [#allocation3], %s3746_s11, %s3746_s11, %s3747_s12  }
0x161e   :  { %3740 = dma.done.wait [#allocation3], 256  }
0x161f   :  { %3741 = vsyncadd [#allocation3], 4294967040 }
0x1620   :  { %2957 = vsyncpa [#allocation3], 1 }

</bundles_post_ra>
